<compile_context>
chip_gen: v7x
topology: tpu7x:2x2x1
jax: 0.10.0
libtpu: 0.0.40
codegen_flags: <defaults>
</compile_context>

<pallas_src>
import functools
import math

import jax
import jax.numpy as jnp
from jax import lax
from jax.experimental import pallas as pl
from jax.experimental.pallas import tpu as pltpu

SUBLANE = 8
LANE = 128


# ----------------------------------------------------------------------------
# Fused Pallas kernel: all LSTM layers + final FC, no grid, in-kernel time loop
# ----------------------------------------------------------------------------
def _make_fused_lstm_kernel(num_layers, seq_len, hidden):
    H = hidden

    def kernel(*refs):
        # refs = (precomp0, h0, c0, w_hh0_t,
        #         [w_x_l, w_h_l, b_l  for l in 1..L-1],
        #         fc_w, fc_b, out)
        pre_ref, h0_ref, c0_ref, w_hh0_ref = refs[0], refs[1], refs[2], refs[3]
        layer_refs = refs[4:4 + 3 * (num_layers - 1)]
        fc_w_ref = refs[4 + 3 * (num_layers - 1)]
        fc_b_ref = refs[5 + 3 * (num_layers - 1)]
        out_ref = refs[6 + 3 * (num_layers - 1)]

        # Hoist loop-invariant weights once and cast to bf16 (MXU operands).
        # NOTE: at H=32 this is ~13 vregs and the unrolled body fits the 64-vreg file; if H
        # or seq_len is scaled up, read the weights from the VMEM refs inside step() and/or
        # lower the unroll factor instead of hoisting, to avoid spills on the serial chain.
        w_hh0 = w_hh0_ref[...].astype(jnp.bfloat16)                     # (H, 4H)
        w_x, w_h, bs = [], [], []
        for l in range(num_layers - 1):
            w_x.append(layer_refs[3 * l][...].astype(jnp.bfloat16))     # (H, 4H)
            w_h.append(layer_refs[3 * l + 1][...].astype(jnp.bfloat16))  # (H, 4H)
            bs.append(layer_refs[3 * l + 2][...])                        # (1, 4H) f32
        fc_w = fc_w_ref[...].astype(jnp.bfloat16)                        # (H, OUT_pad)
        fc_b = fc_b_ref[...]                                             # (1, OUT_pad)

        h_init = tuple(h0_ref[l] for l in range(num_layers))             # (B_pad, H) f32
        c_init = tuple(c0_ref[l] for l in range(num_layers))

        def gate_update(gates, c_prev):
            # Single full-block sigmoid (one EUP pass).  g-gate pre-activations were
            # pre-scaled by 2 at init, so tanh(z) == 2*sigmoid(2z) - 1 == 2*sig - 1.
            sig = jax.nn.sigmoid(gates)
            i_g = sig[:, 0 * H:1 * H]
            f_g = sig[:, 1 * H:2 * H]
            g_g = 2.0 * sig[:, 2 * H:3 * H] - 1.0
            o_g = sig[:, 3 * H:4 * H]
            c_new = f_g * c_prev + i_g * g_g
            h_new = o_g * jnp.tanh(c_new)
            return h_new, c_new

        def step(t, carry):
            hs, cs = carry
            new_hs, new_cs = [], []
            # Layer 0: input projection (and bias) precomputed for all timesteps; only the
            # recurrent h @ W_hh dot sits on the critical path.
            gates = pre_ref[t] + jnp.dot(hs[0].astype(jnp.bfloat16), w_hh0,
                                         preferred_element_type=jnp.float32)
            h_new, c_new = gate_update(gates, cs[0])
            new_hs.append(h_new)
            new_cs.append(c_new)
            inp = h_new
            # Layers >= 1: two dots accumulated into one f32 result (no lane concat;
            # MRB accumulation on v7x, ~neutral on v5e/v6e).
            for l in range(1, num_layers):
                j = l - 1
                gates = (jnp.dot(inp.astype(jnp.bfloat16), w_x[j],
                                 preferred_element_type=jnp.float32)
                         + jnp.dot(hs[l].astype(jnp.bfloat16), w_h[j],
                                   preferred_element_type=jnp.float32)
                         + bs[j])
                h_new, c_new = gate_update(gates, cs[l])
                new_hs.append(h_new)
                new_cs.append(c_new)
                inp = h_new
            return tuple(new_hs), tuple(new_cs)

        # Sequential time recurrence, fully unrolled (seq_len is small and static).
        hs, _ = lax.fori_loop(0, seq_len, step, (h_init, c_init), unroll=True)

        # pred = fc(h_T of last layer) == fc(output)[:, -1, :]  (lane-dense 128-wide store).
        out_ref[...] = (
            jnp.dot(hs[-1].astype(jnp.bfloat16), fc_w,
                    preferred_element_type=jnp.float32) + fc_b
        )

    return kernel


# ----------------------------------------------------------------------------
# Wrapper
# ----------------------------------------------------------------------------
@functools.partial(jax.jit, static_argnames=("num_layers",))
def lstm_forward(params, input_seq, h0, c0, *, num_layers):
    """input_seq: (B, S, IN); h0/c0: (L, B, H) -> pred: (B, OUT)."""
    batch, seq_len, _ = input_seq.shape
    hidden = h0.shape[-1]
    out_dim = params["fc_w_t"].shape[1]

    # Pad batch to the 8-row sublane width (padded rows are independent garbage, sliced off).
    b_pad = max(SUBLANE, -(-batch // SUBLANE) * SUBLANE)
    pad_b = b_pad - batch
    x = jnp.transpose(input_seq, (1, 0, 2))                       # (S, B, IN) time-major
    x = jnp.pad(x, ((0, 0), (0, pad_b), (0, 0)))                  # (S, B_pad, IN)
    h0_p = jnp.pad(h0, ((0, 0), (0, pad_b), (0, 0)))
    c0_p = jnp.pad(c0, ((0, 0), (0, pad_b), (0, 0)))

    # Hoisted layer-0 input projection for ALL timesteps (one big matmul, off the critical
    # path; also keeps the lane-sparse IN=4 input out of the kernel).  Bias already folded in.
    precomp0 = (
        jnp.einsum("sbi,ig->sbg", x, params["w_ih0_t"]) + params["b_0"]
    )                                                             # (S, B_pad, 4H) f32

    # Lane-dense FC: zero-pad weights/bias to a multiple of 128 output lanes.
    out_pad = max(LANE, -(-out_dim // LANE) * LANE)
    fc_w = jnp.pad(params["fc_w_t"], ((0, 0), (0, out_pad - out_dim)))
    fc_b = jnp.pad(params["fc_b"], ((0, 0), (0, out_pad - out_dim)))

    inputs = [precomp0, h0_p, c0_p, params["w_hh0_t"]]
    for l in range(1, num_layers):
        inputs += [params[f"w_x_{l}"], params[f"w_h_{l}"], params[f"b_{l}"]]
    inputs += [fc_w, fc_b]

    kernel = _make_fused_lstm_kernel(num_layers, seq_len, hidden)
    vmem_spec = pl.BlockSpec(memory_space=pltpu.MemorySpace.VMEM)
    # Grid-less: the recurrence is inherently sequential and everything (~0.1 MiB) fits in
    # VMEM on v5e/v6e (128 MiB) and v7x (64 MiB).
    # TODO(synk): on v7x with batch > 8, add a leading "parallel" grid axis over batch tiles
    # (or a core_map over the 2-TC mesh) so both TensorCores run half the batch each.
    pred = pl.pallas_call(
        kernel,
        out_shape=jax.ShapeDtypeStruct((b_pad, out_pad), jnp.float32),
        in_specs=[vmem_spec] * len(inputs),
        out_specs=vmem_spec,
    )(*inputs)
    return pred[:batch, :out_dim]


# ----------------------------------------------------------------------------
# Deterministic parameter init (PyTorch-style uniform(-1/sqrt(H), 1/sqrt(H)))
# ----------------------------------------------------------------------------
def init_params(key, input_size, hidden_size, num_layers, output_size):
    params = {}
    H = hidden_size
    bound = 1.0 / math.sqrt(H)
    # g-gate columns pre-scaled by 2 so the kernel can use tanh(z) = 2*sigmoid(2z) - 1.
    g_scale = jnp.concatenate(
        [jnp.ones((2 * H,)), 2.0 * jnp.ones((H,)), jnp.ones((H,))]
    ).astype(jnp.float32)
    for layer in range(num_layers):
        in_dim = input_size if layer == 0 else H
        key, k1, k2, k3, k4 = jax.random.split(key, 5)
        w_ih = jax.random.uniform(k1, (4 * H, in_dim), jnp.float32, -bound, bound)
        w_hh = jax.random.uniform(k2, (4 * H, H), jnp.float32, -bound, bound)
        b_ih = jax.random.uniform(k3, (4 * H,), jnp.float32, -bound, bound)
        b_hh = jax.random.uniform(k4, (4 * H,), jnp.float32, -bound, bound)
        b = b_ih + b_hh
        # Raw (PyTorch-form) parameters, used by the pure-JAX reference.
        params[f"w_ih_{layer}"] = w_ih
        params[f"w_hh_{layer}"] = w_hh
        params[f"b_raw_{layer}"] = b
        # Kernel-form parameters: transposed + g-gate columns scaled by 2.
        w_ih_t = jnp.transpose(w_ih) * g_scale[None, :]           # (in_dim, 4H)
        w_hh_t = jnp.transpose(w_hh) * g_scale[None, :]           # (H, 4H)
        b_s = (b * g_scale).reshape(1, 4 * H)
        if layer == 0:
            params["w_ih0_t"] = w_ih_t       # used in the wrapper's hoisted projection
            params["w_hh0_t"] = w_hh_t
            params["b_0"] = b_s              # folded into the hoisted projection
        else:
            params[f"w_x_{layer}"] = w_ih_t
            params[f"w_h_{layer}"] = w_hh_t
            params[f"b_{layer}"] = b_s
    key, k1, k2 = jax.random.split(key, 3)
    fc_w = jax.random.uniform(k1, (output_size, H), jnp.float32, -bound, bound)
    fc_b = jax.random.uniform(k2, (output_size,), jnp.float32, -bound, bound)
    params["fc_w_t"] = jnp.transpose(fc_w)                        # (H, OUT)
    params["fc_b"] = fc_b.reshape(1, output_size)
    return params


# ----------------------------------------------------------------------------
# Pure-JAX reference (no Pallas) for a correctness sanity check
# ----------------------------------------------------------------------------
def lstm_reference(params, input_seq, h0, c0, num_layers):
    B, S, _ = input_seq.shape
    H = h0.shape[-1]
    out = input_seq
    for l in range(num_layers):
        w_ih = params[f"w_ih_{l}"]
        w_hh = params[f"w_hh_{l}"]
        b = params[f"b_raw_{l}"]
        h, c = h0[l], c0[l]
        hs = []
        for t in range(S):
            gates = out[:, t, :] @ w_ih.T + h @ w_hh.T + b
            i_g = jax.nn.sigmoid(gates[:, 0 * H:1 * H])
            f_g = jax.nn.sigmoid(gates[:, 1 * H:2 * H])
            g_g = jnp.tanh(gates[:, 2 * H:3 * H])
            o_g = jax.nn.sigmoid(gates[:, 3 * H:4 * H])
            c = f_g * c + i_g * g_g
            h = o_g * jnp.tanh(c)
            hs.append(h)
        out = jnp.stack(hs, axis=1)
    return out[:, -1, :] @ params["fc_w_t"] + params["fc_b"]


# ----------------------------------------------------------------------------
if __name__ == "__main__":
    input_size = 4
    hidden_size = 32
    num_layers = 2
    output_size = 1
    batch_size = 2
    seq_len = 8

    root = jax.random.PRNGKey(0)
    k_param, k_x, k_h, k_c = jax.random.split(root, 4)

    params = init_params(k_param, input_size, hidden_size, num_layers, output_size)

    input_seq = jax.random.normal(k_x, (batch_size, seq_len, input_size), jnp.float32)
    # randn initial states, as in the PyTorch forward (deterministic JAX PRNG here)
    h0 = jax.random.normal(k_h, (num_layers, batch_size, hidden_size), jnp.float32)
    c0 = jax.random.normal(k_c, (num_layers, batch_size, hidden_size), jnp.float32)

    pred = lstm_forward(params, input_seq, h0, c0, num_layers=num_layers)
    jax.block_until_ready(pred)

    assert pred.shape == (batch_size, output_size)

    ref = lstm_reference(params, input_seq, h0, c0, num_layers)
    max_diff = float(jnp.max(jnp.abs(pred - ref)))
    assert jnp.allclose(pred, ref, atol=2e-2, rtol=2e-2), f"max abs diff {max_diff}"

    print("KERNEL_OK")
</pallas_src>

<mosaic_0001>
module attributes {stable_mosaic.version = 11 : i64} {
  func.func @kernel(%arg0: memref<8x8x128xf32, #tpu.memory_space<vmem>>, %arg1: memref<2x8x32xf32, #tpu.memory_space<vmem>>, %arg2: memref<2x8x32xf32, #tpu.memory_space<vmem>>, %arg3: memref<32x128xf32, #tpu.memory_space<vmem>>, %arg4: memref<32x128xf32, #tpu.memory_space<vmem>>, %arg5: memref<32x128xf32, #tpu.memory_space<vmem>>, %arg6: memref<1x128xf32, #tpu.memory_space<vmem>>, %arg7: memref<32x128xf32, #tpu.memory_space<vmem>>, %arg8: memref<1x128xf32, #tpu.memory_space<vmem>>, %arg9: memref<8x128xf32, #tpu.memory_space<vmem>>) attributes {dimension_semantics = [], scalar_prefetch = 0 : i64, scratch_operands = 0 : i64, tpu.core_type = #tpu.core_type<tc>} {
    %c0 = arith.constant 0 : index
    %c0_0 = arith.constant 0 : index
    %0 = vector.load %arg3[%c0, %c0_0] : memref<32x128xf32, #tpu.memory_space<vmem>>, vector<32x128xf32>
    %1 = arith.truncf %0 : vector<32x128xf32> to vector<32x128xbf16>
    %c0_1 = arith.constant 0 : index
    %c0_2 = arith.constant 0 : index
    %2 = vector.load %arg4[%c0_1, %c0_2] : memref<32x128xf32, #tpu.memory_space<vmem>>, vector<32x128xf32>
    %3 = arith.truncf %2 : vector<32x128xf32> to vector<32x128xbf16>
    %c0_3 = arith.constant 0 : index
    %c0_4 = arith.constant 0 : index
    %4 = vector.load %arg5[%c0_3, %c0_4] : memref<32x128xf32, #tpu.memory_space<vmem>>, vector<32x128xf32>
    %5 = arith.truncf %4 : vector<32x128xf32> to vector<32x128xbf16>
    %c0_5 = arith.constant 0 : index
    %c0_6 = arith.constant 0 : index
    %6 = vector.load %arg6[%c0_5, %c0_6] : memref<1x128xf32, #tpu.memory_space<vmem>>, vector<1x128xf32>
    %c0_7 = arith.constant 0 : index
    %c0_8 = arith.constant 0 : index
    %7 = vector.load %arg7[%c0_7, %c0_8] : memref<32x128xf32, #tpu.memory_space<vmem>>, vector<32x128xf32>
    %8 = arith.truncf %7 : vector<32x128xf32> to vector<32x128xbf16>
    %c0_9 = arith.constant 0 : index
    %c0_10 = arith.constant 0 : index
    %9 = vector.load %arg8[%c0_9, %c0_10] : memref<1x128xf32, #tpu.memory_space<vmem>>, vector<1x128xf32>
    %c0_11 = arith.constant 0 : index
    %c0_12 = arith.constant 0 : index
    %c0_13 = arith.constant 0 : index
    %10 = vector.load %arg1[%c0_11, %c0_12, %c0_13] : memref<2x8x32xf32, #tpu.memory_space<vmem>>, vector<1x8x32xf32>
    %11 = vector.shape_cast %10 : vector<1x8x32xf32> to vector<8x32xf32>
    %c1 = arith.constant 1 : index
    %c0_14 = arith.constant 0 : index
    %c0_15 = arith.constant 0 : index
    %12 = vector.load %arg1[%c1, %c0_14, %c0_15] : memref<2x8x32xf32, #tpu.memory_space<vmem>>, vector<1x8x32xf32>
    %13 = vector.shape_cast %12 : vector<1x8x32xf32> to vector<8x32xf32>
    %c0_16 = arith.constant 0 : index
    %c0_17 = arith.constant 0 : index
    %c0_18 = arith.constant 0 : index
    %14 = vector.load %arg2[%c0_16, %c0_17, %c0_18] : memref<2x8x32xf32, #tpu.memory_space<vmem>>, vector<1x8x32xf32>
    %15 = vector.shape_cast %14 : vector<1x8x32xf32> to vector<8x32xf32>
    %c1_19 = arith.constant 1 : index
    %c0_20 = arith.constant 0 : index
    %c0_21 = arith.constant 0 : index
    %16 = vector.load %arg2[%c1_19, %c0_20, %c0_21] : memref<2x8x32xf32, #tpu.memory_space<vmem>>, vector<1x8x32xf32>
    %17 = vector.shape_cast %16 : vector<1x8x32xf32> to vector<8x32xf32>
    %c0_i32 = arith.constant 0 : i32
    %18 = arith.index_cast %c0_i32 : i32 to index
    %c0_22 = arith.constant 0 : index
    %c0_23 = arith.constant 0 : index
    %19 = vector.load %arg0[%18, %c0_22, %c0_23] : memref<8x8x128xf32, #tpu.memory_space<vmem>>, vector<1x8x128xf32>
    %20 = vector.shape_cast %19 : vector<1x8x128xf32> to vector<8x128xf32>
    %21 = arith.truncf %11 : vector<8x32xf32> to vector<8x32xbf16>
    %cst = arith.constant dense<0.000000e+00> : vector<8x128xf32>
    %22 = tpu.matmul %21, %1, %cst {dimension_numbers = #tpu.dot_dimension_numbers<[1], [0], [0], [1], [0, 0, 1, 1], [], []>} : vector<8x32xbf16>, vector<32x128xbf16>, vector<8x128xf32> -> vector<8x128xf32>
    %23 = arith.addf %20, %22 : vector<8x128xf32>
    %24 = arith.negf %23 : vector<8x128xf32>
    %25 = math.exp %24 : vector<8x128xf32>
    %cst_24 = arith.constant 1.000000e+00 : f32
    %26 = vector.broadcast %cst_24 : f32 to vector<8x128xf32>
    %27 = arith.addf %26, %25 : vector<8x128xf32>
    %28 = arith.divf %26, %27 : vector<8x128xf32>
    %29 = vector.extract_strided_slice %28 {offsets = [0, 0], sizes = [8, 32], strides = [1, 1]} : vector<8x128xf32> to vector<8x32xf32>
    %30 = vector.extract_strided_slice %28 {offsets = [0, 32], sizes = [8, 32], strides = [1, 1]} : vector<8x128xf32> to vector<8x32xf32>
    %31 = vector.extract_strided_slice %28 {offsets = [0, 64], sizes = [8, 32], strides = [1, 1]} : vector<8x128xf32> to vector<8x32xf32>
    %cst_25 = arith.constant 2.000000e+00 : f32
    %32 = vector.broadcast %cst_25 : f32 to vector<8x32xf32>
    %33 = arith.mulf %32, %31 : vector<8x32xf32>
    %cst_26 = arith.constant 1.000000e+00 : f32
    %34 = vector.broadcast %cst_26 : f32 to vector<8x32xf32>
    %35 = arith.subf %33, %34 : vector<8x32xf32>
    %36 = vector.extract_strided_slice %28 {offsets = [0, 96], sizes = [8, 32], strides = [1, 1]} : vector<8x128xf32> to vector<8x32xf32>
    %37 = arith.mulf %30, %15 : vector<8x32xf32>
    %38 = arith.mulf %29, %35 : vector<8x32xf32>
    %39 = arith.addf %37, %38 : vector<8x32xf32>
    %40 = math.tanh %39 : vector<8x32xf32>
    %41 = arith.mulf %36, %40 : vector<8x32xf32>
    %42 = arith.truncf %41 : vector<8x32xf32> to vector<8x32xbf16>
    %cst_27 = arith.constant dense<0.000000e+00> : vector<8x128xf32>
    %43 = tpu.matmul %42, %3, %cst_27 {dimension_numbers = #tpu.dot_dimension_numbers<[1], [0], [0], [1], [0, 0, 1, 1], [], []>} : vector<8x32xbf16>, vector<32x128xbf16>, vector<8x128xf32> -> vector<8x128xf32>
    %44 = arith.truncf %13 : vector<8x32xf32> to vector<8x32xbf16>
    %cst_28 = arith.constant dense<0.000000e+00> : vector<8x128xf32>
    %45 = tpu.matmul %44, %5, %cst_28 {dimension_numbers = #tpu.dot_dimension_numbers<[1], [0], [0], [1], [0, 0, 1, 1], [], []>} : vector<8x32xbf16>, vector<32x128xbf16>, vector<8x128xf32> -> vector<8x128xf32>
    %46 = arith.addf %43, %45 : vector<8x128xf32>
    %47 = vector.broadcast %6 : vector<1x128xf32> to vector<8x128xf32>
    %48 = arith.addf %46, %47 : vector<8x128xf32>
    %49 = arith.negf %48 : vector<8x128xf32>
    %50 = math.exp %49 : vector<8x128xf32>
    %cst_29 = arith.constant 1.000000e+00 : f32
    %51 = vector.broadcast %cst_29 : f32 to vector<8x128xf32>
    %52 = arith.addf %51, %50 : vector<8x128xf32>
    %53 = arith.divf %51, %52 : vector<8x128xf32>
    %54 = vector.extract_strided_slice %53 {offsets = [0, 0], sizes = [8, 32], strides = [1, 1]} : vector<8x128xf32> to vector<8x32xf32>
    %55 = vector.extract_strided_slice %53 {offsets = [0, 32], sizes = [8, 32], strides = [1, 1]} : vector<8x128xf32> to vector<8x32xf32>
    %56 = vector.extract_strided_slice %53 {offsets = [0, 64], sizes = [8, 32], strides = [1, 1]} : vector<8x128xf32> to vector<8x32xf32>
    %cst_30 = arith.constant 2.000000e+00 : f32
    %57 = vector.broadcast %cst_30 : f32 to vector<8x32xf32>
    %58 = arith.mulf %57, %56 : vector<8x32xf32>
    %cst_31 = arith.constant 1.000000e+00 : f32
    %59 = vector.broadcast %cst_31 : f32 to vector<8x32xf32>
    %60 = arith.subf %58, %59 : vector<8x32xf32>
    %61 = vector.extract_strided_slice %53 {offsets = [0, 96], sizes = [8, 32], strides = [1, 1]} : vector<8x128xf32> to vector<8x32xf32>
    %62 = arith.mulf %55, %17 : vector<8x32xf32>
    %63 = arith.mulf %54, %60 : vector<8x32xf32>
    %64 = arith.addf %62, %63 : vector<8x32xf32>
    %65 = math.tanh %64 : vector<8x32xf32>
    %66 = arith.mulf %61, %65 : vector<8x32xf32>
    %c1_i32 = arith.constant 1 : i32
    %67 = arith.index_cast %c1_i32 : i32 to index
    %c0_32 = arith.constant 0 : index
    %c0_33 = arith.constant 0 : index
    %68 = vector.load %arg0[%67, %c0_32, %c0_33] : memref<8x8x128xf32, #tpu.memory_space<vmem>>, vector<1x8x128xf32>
    %69 = vector.shape_cast %68 : vector<1x8x128xf32> to vector<8x128xf32>
    %70 = arith.truncf %41 : vector<8x32xf32> to vector<8x32xbf16>
    %cst_34 = arith.constant dense<0.000000e+00> : vector<8x128xf32>
    %71 = tpu.matmul %70, %1, %cst_34 {dimension_numbers = #tpu.dot_dimension_numbers<[1], [0], [0], [1], [0, 0, 1, 1], [], []>} : vector<8x32xbf16>, vector<32x128xbf16>, vector<8x128xf32> -> vector<8x128xf32>
    %72 = arith.addf %69, %71 : vector<8x128xf32>
    %73 = arith.negf %72 : vector<8x128xf32>
    %74 = math.exp %73 : vector<8x128xf32>
    %cst_35 = arith.constant 1.000000e+00 : f32
    %75 = vector.broadcast %cst_35 : f32 to vector<8x128xf32>
    %76 = arith.addf %75, %74 : vector<8x128xf32>
    %77 = arith.divf %75, %76 : vector<8x128xf32>
    %78 = vector.extract_strided_slice %77 {offsets = [0, 0], sizes = [8, 32], strides = [1, 1]} : vector<8x128xf32> to vector<8x32xf32>
    %79 = vector.extract_strided_slice %77 {offsets = [0, 32], sizes = [8, 32], strides = [1, 1]} : vector<8x128xf32> to vector<8x32xf32>
    %80 = vector.extract_strided_slice %77 {offsets = [0, 64], sizes = [8, 32], strides = [1, 1]} : vector<8x128xf32> to vector<8x32xf32>
    %cst_36 = arith.constant 2.000000e+00 : f32
    %81 = vector.broadcast %cst_36 : f32 to vector<8x32xf32>
    %82 = arith.mulf %81, %80 : vector<8x32xf32>
    %cst_37 = arith.constant 1.000000e+00 : f32
    %83 = vector.broadcast %cst_37 : f32 to vector<8x32xf32>
    %84 = arith.subf %82, %83 : vector<8x32xf32>
    %85 = vector.extract_strided_slice %77 {offsets = [0, 96], sizes = [8, 32], strides = [1, 1]} : vector<8x128xf32> to vector<8x32xf32>
    %86 = arith.mulf %79, %39 : vector<8x32xf32>
    %87 = arith.mulf %78, %84 : vector<8x32xf32>
    %88 = arith.addf %86, %87 : vector<8x32xf32>
    %89 = math.tanh %88 : vector<8x32xf32>
    %90 = arith.mulf %85, %89 : vector<8x32xf32>
    %91 = arith.truncf %90 : vector<8x32xf32> to vector<8x32xbf16>
    %cst_38 = arith.constant dense<0.000000e+00> : vector<8x128xf32>
    %92 = tpu.matmul %91, %3, %cst_38 {dimension_numbers = #tpu.dot_dimension_numbers<[1], [0], [0], [1], [0, 0, 1, 1], [], []>} : vector<8x32xbf16>, vector<32x128xbf16>, vector<8x128xf32> -> vector<8x128xf32>
    %93 = arith.truncf %66 : vector<8x32xf32> to vector<8x32xbf16>
    %cst_39 = arith.constant dense<0.000000e+00> : vector<8x128xf32>
    %94 = tpu.matmul %93, %5, %cst_39 {dimension_numbers = #tpu.dot_dimension_numbers<[1], [0], [0], [1], [0, 0, 1, 1], [], []>} : vector<8x32xbf16>, vector<32x128xbf16>, vector<8x128xf32> -> vector<8x128xf32>
    %95 = arith.addf %92, %94 : vector<8x128xf32>
    %96 = vector.broadcast %6 : vector<1x128xf32> to vector<8x128xf32>
    %97 = arith.addf %95, %96 : vector<8x128xf32>
    %98 = arith.negf %97 : vector<8x128xf32>
    %99 = math.exp %98 : vector<8x128xf32>
    %cst_40 = arith.constant 1.000000e+00 : f32
    %100 = vector.broadcast %cst_40 : f32 to vector<8x128xf32>
    %101 = arith.addf %100, %99 : vector<8x128xf32>
    %102 = arith.divf %100, %101 : vector<8x128xf32>
    %103 = vector.extract_strided_slice %102 {offsets = [0, 0], sizes = [8, 32], strides = [1, 1]} : vector<8x128xf32> to vector<8x32xf32>
    %104 = vector.extract_strided_slice %102 {offsets = [0, 32], sizes = [8, 32], strides = [1, 1]} : vector<8x128xf32> to vector<8x32xf32>
    %105 = vector.extract_strided_slice %102 {offsets = [0, 64], sizes = [8, 32], strides = [1, 1]} : vector<8x128xf32> to vector<8x32xf32>
    %cst_41 = arith.constant 2.000000e+00 : f32
    %106 = vector.broadcast %cst_41 : f32 to vector<8x32xf32>
    %107 = arith.mulf %106, %105 : vector<8x32xf32>
    %cst_42 = arith.constant 1.000000e+00 : f32
    %108 = vector.broadcast %cst_42 : f32 to vector<8x32xf32>
    %109 = arith.subf %107, %108 : vector<8x32xf32>
    %110 = vector.extract_strided_slice %102 {offsets = [0, 96], sizes = [8, 32], strides = [1, 1]} : vector<8x128xf32> to vector<8x32xf32>
    %111 = arith.mulf %104, %64 : vector<8x32xf32>
    %112 = arith.mulf %103, %109 : vector<8x32xf32>
    %113 = arith.addf %111, %112 : vector<8x32xf32>
    %114 = math.tanh %113 : vector<8x32xf32>
    %115 = arith.mulf %110, %114 : vector<8x32xf32>
    %c2_i32 = arith.constant 2 : i32
    %116 = arith.index_cast %c2_i32 : i32 to index
    %c0_43 = arith.constant 0 : index
    %c0_44 = arith.constant 0 : index
    %117 = vector.load %arg0[%116, %c0_43, %c0_44] : memref<8x8x128xf32, #tpu.memory_space<vmem>>, vector<1x8x128xf32>
    %118 = vector.shape_cast %117 : vector<1x8x128xf32> to vector<8x128xf32>
    %119 = arith.truncf %90 : vector<8x32xf32> to vector<8x32xbf16>
    %cst_45 = arith.constant dense<0.000000e+00> : vector<8x128xf32>
    %120 = tpu.matmul %119, %1, %cst_45 {dimension_numbers = #tpu.dot_dimension_numbers<[1], [0], [0], [1], [0, 0, 1, 1], [], []>} : vector<8x32xbf16>, vector<32x128xbf16>, vector<8x128xf32> -> vector<8x128xf32>
    %121 = arith.addf %118, %120 : vector<8x128xf32>
    %122 = arith.negf %121 : vector<8x128xf32>
    %123 = math.exp %122 : vector<8x128xf32>
    %cst_46 = arith.constant 1.000000e+00 : f32
    %124 = vector.broadcast %cst_46 : f32 to vector<8x128xf32>
    %125 = arith.addf %124, %123 : vector<8x128xf32>
    %126 = arith.divf %124, %125 : vector<8x128xf32>
    %127 = vector.extract_strided_slice %126 {offsets = [0, 0], sizes = [8, 32], strides = [1, 1]} : vector<8x128xf32> to vector<8x32xf32>
    %128 = vector.extract_strided_slice %126 {offsets = [0, 32], sizes = [8, 32], strides = [1, 1]} : vector<8x128xf32> to vector<8x32xf32>
    %129 = vector.extract_strided_slice %126 {offsets = [0, 64], sizes = [8, 32], strides = [1, 1]} : vector<8x128xf32> to vector<8x32xf32>
    %cst_47 = arith.constant 2.000000e+00 : f32
    %130 = vector.broadcast %cst_47 : f32 to vector<8x32xf32>
    %131 = arith.mulf %130, %129 : vector<8x32xf32>
    %cst_48 = arith.constant 1.000000e+00 : f32
    %132 = vector.broadcast %cst_48 : f32 to vector<8x32xf32>
    %133 = arith.subf %131, %132 : vector<8x32xf32>
    %134 = vector.extract_strided_slice %126 {offsets = [0, 96], sizes = [8, 32], strides = [1, 1]} : vector<8x128xf32> to vector<8x32xf32>
    %135 = arith.mulf %128, %88 : vector<8x32xf32>
    %136 = arith.mulf %127, %133 : vector<8x32xf32>
    %137 = arith.addf %135, %136 : vector<8x32xf32>
    %138 = math.tanh %137 : vector<8x32xf32>
    %139 = arith.mulf %134, %138 : vector<8x32xf32>
    %140 = arith.truncf %139 : vector<8x32xf32> to vector<8x32xbf16>
    %cst_49 = arith.constant dense<0.000000e+00> : vector<8x128xf32>
    %141 = tpu.matmul %140, %3, %cst_49 {dimension_numbers = #tpu.dot_dimension_numbers<[1], [0], [0], [1], [0, 0, 1, 1], [], []>} : vector<8x32xbf16>, vector<32x128xbf16>, vector<8x128xf32> -> vector<8x128xf32>
    %142 = arith.truncf %115 : vector<8x32xf32> to vector<8x32xbf16>
    %cst_50 = arith.constant dense<0.000000e+00> : vector<8x128xf32>
    %143 = tpu.matmul %142, %5, %cst_50 {dimension_numbers = #tpu.dot_dimension_numbers<[1], [0], [0], [1], [0, 0, 1, 1], [], []>} : vector<8x32xbf16>, vector<32x128xbf16>, vector<8x128xf32> -> vector<8x128xf32>
    %144 = arith.addf %141, %143 : vector<8x128xf32>
    %145 = vector.broadcast %6 : vector<1x128xf32> to vector<8x128xf32>
    %146 = arith.addf %144, %145 : vector<8x128xf32>
    %147 = arith.negf %146 : vector<8x128xf32>
    %148 = math.exp %147 : vector<8x128xf32>
    %cst_51 = arith.constant 1.000000e+00 : f32
    %149 = vector.broadcast %cst_51 : f32 to vector<8x128xf32>
    %150 = arith.addf %149, %148 : vector<8x128xf32>
    %151 = arith.divf %149, %150 : vector<8x128xf32>
    %152 = vector.extract_strided_slice %151 {offsets = [0, 0], sizes = [8, 32], strides = [1, 1]} : vector<8x128xf32> to vector<8x32xf32>
    %153 = vector.extract_strided_slice %151 {offsets = [0, 32], sizes = [8, 32], strides = [1, 1]} : vector<8x128xf32> to vector<8x32xf32>
    %154 = vector.extract_strided_slice %151 {offsets = [0, 64], sizes = [8, 32], strides = [1, 1]} : vector<8x128xf32> to vector<8x32xf32>
    %cst_52 = arith.constant 2.000000e+00 : f32
    %155 = vector.broadcast %cst_52 : f32 to vector<8x32xf32>
    %156 = arith.mulf %155, %154 : vector<8x32xf32>
    %cst_53 = arith.constant 1.000000e+00 : f32
    %157 = vector.broadcast %cst_53 : f32 to vector<8x32xf32>
    %158 = arith.subf %156, %157 : vector<8x32xf32>
    %159 = vector.extract_strided_slice %151 {offsets = [0, 96], sizes = [8, 32], strides = [1, 1]} : vector<8x128xf32> to vector<8x32xf32>
    %160 = arith.mulf %153, %113 : vector<8x32xf32>
    %161 = arith.mulf %152, %158 : vector<8x32xf32>
    %162 = arith.addf %160, %161 : vector<8x32xf32>
    %163 = math.tanh %162 : vector<8x32xf32>
    %164 = arith.mulf %159, %163 : vector<8x32xf32>
    %c3_i32 = arith.constant 3 : i32
    %165 = arith.index_cast %c3_i32 : i32 to index
    %c0_54 = arith.constant 0 : index
    %c0_55 = arith.constant 0 : index
    %166 = vector.load %arg0[%165, %c0_54, %c0_55] : memref<8x8x128xf32, #tpu.memory_space<vmem>>, vector<1x8x128xf32>
    %167 = vector.shape_cast %166 : vector<1x8x128xf32> to vector<8x128xf32>
    %168 = arith.truncf %139 : vector<8x32xf32> to vector<8x32xbf16>
    %cst_56 = arith.constant dense<0.000000e+00> : vector<8x128xf32>
    %169 = tpu.matmul %168, %1, %cst_56 {dimension_numbers = #tpu.dot_dimension_numbers<[1], [0], [0], [1], [0, 0, 1, 1], [], []>} : vector<8x32xbf16>, vector<32x128xbf16>, vector<8x128xf32> -> vector<8x128xf32>
    %170 = arith.addf %167, %169 : vector<8x128xf32>
    %171 = arith.negf %170 : vector<8x128xf32>
    %172 = math.exp %171 : vector<8x128xf32>
    %cst_57 = arith.constant 1.000000e+00 : f32
    %173 = vector.broadcast %cst_57 : f32 to vector<8x128xf32>
    %174 = arith.addf %173, %172 : vector<8x128xf32>
    %175 = arith.divf %173, %174 : vector<8x128xf32>
    %176 = vector.extract_strided_slice %175 {offsets = [0, 0], sizes = [8, 32], strides = [1, 1]} : vector<8x128xf32> to vector<8x32xf32>
    %177 = vector.extract_strided_slice %175 {offsets = [0, 32], sizes = [8, 32], strides = [1, 1]} : vector<8x128xf32> to vector<8x32xf32>
    %178 = vector.extract_strided_slice %175 {offsets = [0, 64], sizes = [8, 32], strides = [1, 1]} : vector<8x128xf32> to vector<8x32xf32>
    %cst_58 = arith.constant 2.000000e+00 : f32
    %179 = vector.broadcast %cst_58 : f32 to vector<8x32xf32>
    %180 = arith.mulf %179, %178 : vector<8x32xf32>
    %cst_59 = arith.constant 1.000000e+00 : f32
    %181 = vector.broadcast %cst_59 : f32 to vector<8x32xf32>
    %182 = arith.subf %180, %181 : vector<8x32xf32>
    %183 = vector.extract_strided_slice %175 {offsets = [0, 96], sizes = [8, 32], strides = [1, 1]} : vector<8x128xf32> to vector<8x32xf32>
    %184 = arith.mulf %177, %137 : vector<8x32xf32>
    %185 = arith.mulf %176, %182 : vector<8x32xf32>
    %186 = arith.addf %184, %185 : vector<8x32xf32>
    %187 = math.tanh %186 : vector<8x32xf32>
    %188 = arith.mulf %183, %187 : vector<8x32xf32>
    %189 = arith.truncf %188 : vector<8x32xf32> to vector<8x32xbf16>
    %cst_60 = arith.constant dense<0.000000e+00> : vector<8x128xf32>
    %190 = tpu.matmul %189, %3, %cst_60 {dimension_numbers = #tpu.dot_dimension_numbers<[1], [0], [0], [1], [0, 0, 1, 1], [], []>} : vector<8x32xbf16>, vector<32x128xbf16>, vector<8x128xf32> -> vector<8x128xf32>
    %191 = arith.truncf %164 : vector<8x32xf32> to vector<8x32xbf16>
    %cst_61 = arith.constant dense<0.000000e+00> : vector<8x128xf32>
    %192 = tpu.matmul %191, %5, %cst_61 {dimension_numbers = #tpu.dot_dimension_numbers<[1], [0], [0], [1], [0, 0, 1, 1], [], []>} : vector<8x32xbf16>, vector<32x128xbf16>, vector<8x128xf32> -> vector<8x128xf32>
    %193 = arith.addf %190, %192 : vector<8x128xf32>
    %194 = vector.broadcast %6 : vector<1x128xf32> to vector<8x128xf32>
    %195 = arith.addf %193, %194 : vector<8x128xf32>
    %196 = arith.negf %195 : vector<8x128xf32>
    %197 = math.exp %196 : vector<8x128xf32>
    %cst_62 = arith.constant 1.000000e+00 : f32
    %198 = vector.broadcast %cst_62 : f32 to vector<8x128xf32>
    %199 = arith.addf %198, %197 : vector<8x128xf32>
    %200 = arith.divf %198, %199 : vector<8x128xf32>
    %201 = vector.extract_strided_slice %200 {offsets = [0, 0], sizes = [8, 32], strides = [1, 1]} : vector<8x128xf32> to vector<8x32xf32>
    %202 = vector.extract_strided_slice %200 {offsets = [0, 32], sizes = [8, 32], strides = [1, 1]} : vector<8x128xf32> to vector<8x32xf32>
    %203 = vector.extract_strided_slice %200 {offsets = [0, 64], sizes = [8, 32], strides = [1, 1]} : vector<8x128xf32> to vector<8x32xf32>
    %cst_63 = arith.constant 2.000000e+00 : f32
    %204 = vector.broadcast %cst_63 : f32 to vector<8x32xf32>
    %205 = arith.mulf %204, %203 : vector<8x32xf32>
    %cst_64 = arith.constant 1.000000e+00 : f32
    %206 = vector.broadcast %cst_64 : f32 to vector<8x32xf32>
    %207 = arith.subf %205, %206 : vector<8x32xf32>
    %208 = vector.extract_strided_slice %200 {offsets = [0, 96], sizes = [8, 32], strides = [1, 1]} : vector<8x128xf32> to vector<8x32xf32>
    %209 = arith.mulf %202, %162 : vector<8x32xf32>
    %210 = arith.mulf %201, %207 : vector<8x32xf32>
    %211 = arith.addf %209, %210 : vector<8x32xf32>
    %212 = math.tanh %211 : vector<8x32xf32>
    %213 = arith.mulf %208, %212 : vector<8x32xf32>
    %c4_i32 = arith.constant 4 : i32
    %214 = arith.index_cast %c4_i32 : i32 to index
    %c0_65 = arith.constant 0 : index
    %c0_66 = arith.constant 0 : index
    %215 = vector.load %arg0[%214, %c0_65, %c0_66] : memref<8x8x128xf32, #tpu.memory_space<vmem>>, vector<1x8x128xf32>
    %216 = vector.shape_cast %215 : vector<1x8x128xf32> to vector<8x128xf32>
    %217 = arith.truncf %188 : vector<8x32xf32> to vector<8x32xbf16>
    %cst_67 = arith.constant dense<0.000000e+00> : vector<8x128xf32>
    %218 = tpu.matmul %217, %1, %cst_67 {dimension_numbers = #tpu.dot_dimension_numbers<[1], [0], [0], [1], [0, 0, 1, 1], [], []>} : vector<8x32xbf16>, vector<32x128xbf16>, vector<8x128xf32> -> vector<8x128xf32>
    %219 = arith.addf %216, %218 : vector<8x128xf32>
    %220 = arith.negf %219 : vector<8x128xf32>
    %221 = math.exp %220 : vector<8x128xf32>
    %cst_68 = arith.constant 1.000000e+00 : f32
    %222 = vector.broadcast %cst_68 : f32 to vector<8x128xf32>
    %223 = arith.addf %222, %221 : vector<8x128xf32>
    %224 = arith.divf %222, %223 : vector<8x128xf32>
    %225 = vector.extract_strided_slice %224 {offsets = [0, 0], sizes = [8, 32], strides = [1, 1]} : vector<8x128xf32> to vector<8x32xf32>
    %226 = vector.extract_strided_slice %224 {offsets = [0, 32], sizes = [8, 32], strides = [1, 1]} : vector<8x128xf32> to vector<8x32xf32>
    %227 = vector.extract_strided_slice %224 {offsets = [0, 64], sizes = [8, 32], strides = [1, 1]} : vector<8x128xf32> to vector<8x32xf32>
    %cst_69 = arith.constant 2.000000e+00 : f32
    %228 = vector.broadcast %cst_69 : f32 to vector<8x32xf32>
    %229 = arith.mulf %228, %227 : vector<8x32xf32>
    %cst_70 = arith.constant 1.000000e+00 : f32
    %230 = vector.broadcast %cst_70 : f32 to vector<8x32xf32>
    %231 = arith.subf %229, %230 : vector<8x32xf32>
    %232 = vector.extract_strided_slice %224 {offsets = [0, 96], sizes = [8, 32], strides = [1, 1]} : vector<8x128xf32> to vector<8x32xf32>
    %233 = arith.mulf %226, %186 : vector<8x32xf32>
    %234 = arith.mulf %225, %231 : vector<8x32xf32>
    %235 = arith.addf %233, %234 : vector<8x32xf32>
    %236 = math.tanh %235 : vector<8x32xf32>
    %237 = arith.mulf %232, %236 : vector<8x32xf32>
    %238 = arith.truncf %237 : vector<8x32xf32> to vector<8x32xbf16>
    %cst_71 = arith.constant dense<0.000000e+00> : vector<8x128xf32>
    %239 = tpu.matmul %238, %3, %cst_71 {dimension_numbers = #tpu.dot_dimension_numbers<[1], [0], [0], [1], [0, 0, 1, 1], [], []>} : vector<8x32xbf16>, vector<32x128xbf16>, vector<8x128xf32> -> vector<8x128xf32>
    %240 = arith.truncf %213 : vector<8x32xf32> to vector<8x32xbf16>
    %cst_72 = arith.constant dense<0.000000e+00> : vector<8x128xf32>
    %241 = tpu.matmul %240, %5, %cst_72 {dimension_numbers = #tpu.dot_dimension_numbers<[1], [0], [0], [1], [0, 0, 1, 1], [], []>} : vector<8x32xbf16>, vector<32x128xbf16>, vector<8x128xf32> -> vector<8x128xf32>
    %242 = arith.addf %239, %241 : vector<8x128xf32>
    %243 = vector.broadcast %6 : vector<1x128xf32> to vector<8x128xf32>
    %244 = arith.addf %242, %243 : vector<8x128xf32>
    %245 = arith.negf %244 : vector<8x128xf32>
    %246 = math.exp %245 : vector<8x128xf32>
    %cst_73 = arith.constant 1.000000e+00 : f32
    %247 = vector.broadcast %cst_73 : f32 to vector<8x128xf32>
    %248 = arith.addf %247, %246 : vector<8x128xf32>
    %249 = arith.divf %247, %248 : vector<8x128xf32>
    %250 = vector.extract_strided_slice %249 {offsets = [0, 0], sizes = [8, 32], strides = [1, 1]} : vector<8x128xf32> to vector<8x32xf32>
    %251 = vector.extract_strided_slice %249 {offsets = [0, 32], sizes = [8, 32], strides = [1, 1]} : vector<8x128xf32> to vector<8x32xf32>
    %252 = vector.extract_strided_slice %249 {offsets = [0, 64], sizes = [8, 32], strides = [1, 1]} : vector<8x128xf32> to vector<8x32xf32>
    %cst_74 = arith.constant 2.000000e+00 : f32
    %253 = vector.broadcast %cst_74 : f32 to vector<8x32xf32>
    %254 = arith.mulf %253, %252 : vector<8x32xf32>
    %cst_75 = arith.constant 1.000000e+00 : f32
    %255 = vector.broadcast %cst_75 : f32 to vector<8x32xf32>
    %256 = arith.subf %254, %255 : vector<8x32xf32>
    %257 = vector.extract_strided_slice %249 {offsets = [0, 96], sizes = [8, 32], strides = [1, 1]} : vector<8x128xf32> to vector<8x32xf32>
    %258 = arith.mulf %251, %211 : vector<8x32xf32>
    %259 = arith.mulf %250, %256 : vector<8x32xf32>
    %260 = arith.addf %258, %259 : vector<8x32xf32>
    %261 = math.tanh %260 : vector<8x32xf32>
    %262 = arith.mulf %257, %261 : vector<8x32xf32>
    %c5_i32 = arith.constant 5 : i32
    %263 = arith.index_cast %c5_i32 : i32 to index
    %c0_76 = arith.constant 0 : index
    %c0_77 = arith.constant 0 : index
    %264 = vector.load %arg0[%263, %c0_76, %c0_77] : memref<8x8x128xf32, #tpu.memory_space<vmem>>, vector<1x8x128xf32>
    %265 = vector.shape_cast %264 : vector<1x8x128xf32> to vector<8x128xf32>
    %266 = arith.truncf %237 : vector<8x32xf32> to vector<8x32xbf16>
    %cst_78 = arith.constant dense<0.000000e+00> : vector<8x128xf32>
    %267 = tpu.matmul %266, %1, %cst_78 {dimension_numbers = #tpu.dot_dimension_numbers<[1], [0], [0], [1], [0, 0, 1, 1], [], []>} : vector<8x32xbf16>, vector<32x128xbf16>, vector<8x128xf32> -> vector<8x128xf32>
    %268 = arith.addf %265, %267 : vector<8x128xf32>
    %269 = arith.negf %268 : vector<8x128xf32>
    %270 = math.exp %269 : vector<8x128xf32>
    %cst_79 = arith.constant 1.000000e+00 : f32
    %271 = vector.broadcast %cst_79 : f32 to vector<8x128xf32>
    %272 = arith.addf %271, %270 : vector<8x128xf32>
    %273 = arith.divf %271, %272 : vector<8x128xf32>
    %274 = vector.extract_strided_slice %273 {offsets = [0, 0], sizes = [8, 32], strides = [1, 1]} : vector<8x128xf32> to vector<8x32xf32>
    %275 = vector.extract_strided_slice %273 {offsets = [0, 32], sizes = [8, 32], strides = [1, 1]} : vector<8x128xf32> to vector<8x32xf32>
    %276 = vector.extract_strided_slice %273 {offsets = [0, 64], sizes = [8, 32], strides = [1, 1]} : vector<8x128xf32> to vector<8x32xf32>
    %cst_80 = arith.constant 2.000000e+00 : f32
    %277 = vector.broadcast %cst_80 : f32 to vector<8x32xf32>
    %278 = arith.mulf %277, %276 : vector<8x32xf32>
    %cst_81 = arith.constant 1.000000e+00 : f32
    %279 = vector.broadcast %cst_81 : f32 to vector<8x32xf32>
    %280 = arith.subf %278, %279 : vector<8x32xf32>
    %281 = vector.extract_strided_slice %273 {offsets = [0, 96], sizes = [8, 32], strides = [1, 1]} : vector<8x128xf32> to vector<8x32xf32>
    %282 = arith.mulf %275, %235 : vector<8x32xf32>
    %283 = arith.mulf %274, %280 : vector<8x32xf32>
    %284 = arith.addf %282, %283 : vector<8x32xf32>
    %285 = math.tanh %284 : vector<8x32xf32>
    %286 = arith.mulf %281, %285 : vector<8x32xf32>
    %287 = arith.truncf %286 : vector<8x32xf32> to vector<8x32xbf16>
    %cst_82 = arith.constant dense<0.000000e+00> : vector<8x128xf32>
    %288 = tpu.matmul %287, %3, %cst_82 {dimension_numbers = #tpu.dot_dimension_numbers<[1], [0], [0], [1], [0, 0, 1, 1], [], []>} : vector<8x32xbf16>, vector<32x128xbf16>, vector<8x128xf32> -> vector<8x128xf32>
    %289 = arith.truncf %262 : vector<8x32xf32> to vector<8x32xbf16>
    %cst_83 = arith.constant dense<0.000000e+00> : vector<8x128xf32>
    %290 = tpu.matmul %289, %5, %cst_83 {dimension_numbers = #tpu.dot_dimension_numbers<[1], [0], [0], [1], [0, 0, 1, 1], [], []>} : vector<8x32xbf16>, vector<32x128xbf16>, vector<8x128xf32> -> vector<8x128xf32>
    %291 = arith.addf %288, %290 : vector<8x128xf32>
    %292 = vector.broadcast %6 : vector<1x128xf32> to vector<8x128xf32>
    %293 = arith.addf %291, %292 : vector<8x128xf32>
    %294 = arith.negf %293 : vector<8x128xf32>
    %295 = math.exp %294 : vector<8x128xf32>
    %cst_84 = arith.constant 1.000000e+00 : f32
    %296 = vector.broadcast %cst_84 : f32 to vector<8x128xf32>
    %297 = arith.addf %296, %295 : vector<8x128xf32>
    %298 = arith.divf %296, %297 : vector<8x128xf32>
    %299 = vector.extract_strided_slice %298 {offsets = [0, 0], sizes = [8, 32], strides = [1, 1]} : vector<8x128xf32> to vector<8x32xf32>
    %300 = vector.extract_strided_slice %298 {offsets = [0, 32], sizes = [8, 32], strides = [1, 1]} : vector<8x128xf32> to vector<8x32xf32>
    %301 = vector.extract_strided_slice %298 {offsets = [0, 64], sizes = [8, 32], strides = [1, 1]} : vector<8x128xf32> to vector<8x32xf32>
    %cst_85 = arith.constant 2.000000e+00 : f32
    %302 = vector.broadcast %cst_85 : f32 to vector<8x32xf32>
    %303 = arith.mulf %302, %301 : vector<8x32xf32>
    %cst_86 = arith.constant 1.000000e+00 : f32
    %304 = vector.broadcast %cst_86 : f32 to vector<8x32xf32>
    %305 = arith.subf %303, %304 : vector<8x32xf32>
    %306 = vector.extract_strided_slice %298 {offsets = [0, 96], sizes = [8, 32], strides = [1, 1]} : vector<8x128xf32> to vector<8x32xf32>
    %307 = arith.mulf %300, %260 : vector<8x32xf32>
    %308 = arith.mulf %299, %305 : vector<8x32xf32>
    %309 = arith.addf %307, %308 : vector<8x32xf32>
    %310 = math.tanh %309 : vector<8x32xf32>
    %311 = arith.mulf %306, %310 : vector<8x32xf32>
    %c6_i32 = arith.constant 6 : i32
    %312 = arith.index_cast %c6_i32 : i32 to index
    %c0_87 = arith.constant 0 : index
    %c0_88 = arith.constant 0 : index
    %313 = vector.load %arg0[%312, %c0_87, %c0_88] : memref<8x8x128xf32, #tpu.memory_space<vmem>>, vector<1x8x128xf32>
    %314 = vector.shape_cast %313 : vector<1x8x128xf32> to vector<8x128xf32>
    %315 = arith.truncf %286 : vector<8x32xf32> to vector<8x32xbf16>
    %cst_89 = arith.constant dense<0.000000e+00> : vector<8x128xf32>
    %316 = tpu.matmul %315, %1, %cst_89 {dimension_numbers = #tpu.dot_dimension_numbers<[1], [0], [0], [1], [0, 0, 1, 1], [], []>} : vector<8x32xbf16>, vector<32x128xbf16>, vector<8x128xf32> -> vector<8x128xf32>
    %317 = arith.addf %314, %316 : vector<8x128xf32>
    %318 = arith.negf %317 : vector<8x128xf32>
    %319 = math.exp %318 : vector<8x128xf32>
    %cst_90 = arith.constant 1.000000e+00 : f32
    %320 = vector.broadcast %cst_90 : f32 to vector<8x128xf32>
    %321 = arith.addf %320, %319 : vector<8x128xf32>
    %322 = arith.divf %320, %321 : vector<8x128xf32>
    %323 = vector.extract_strided_slice %322 {offsets = [0, 0], sizes = [8, 32], strides = [1, 1]} : vector<8x128xf32> to vector<8x32xf32>
    %324 = vector.extract_strided_slice %322 {offsets = [0, 32], sizes = [8, 32], strides = [1, 1]} : vector<8x128xf32> to vector<8x32xf32>
    %325 = vector.extract_strided_slice %322 {offsets = [0, 64], sizes = [8, 32], strides = [1, 1]} : vector<8x128xf32> to vector<8x32xf32>
    %cst_91 = arith.constant 2.000000e+00 : f32
    %326 = vector.broadcast %cst_91 : f32 to vector<8x32xf32>
    %327 = arith.mulf %326, %325 : vector<8x32xf32>
    %cst_92 = arith.constant 1.000000e+00 : f32
    %328 = vector.broadcast %cst_92 : f32 to vector<8x32xf32>
    %329 = arith.subf %327, %328 : vector<8x32xf32>
    %330 = vector.extract_strided_slice %322 {offsets = [0, 96], sizes = [8, 32], strides = [1, 1]} : vector<8x128xf32> to vector<8x32xf32>
    %331 = arith.mulf %324, %284 : vector<8x32xf32>
    %332 = arith.mulf %323, %329 : vector<8x32xf32>
    %333 = arith.addf %331, %332 : vector<8x32xf32>
    %334 = math.tanh %333 : vector<8x32xf32>
    %335 = arith.mulf %330, %334 : vector<8x32xf32>
    %336 = arith.truncf %335 : vector<8x32xf32> to vector<8x32xbf16>
    %cst_93 = arith.constant dense<0.000000e+00> : vector<8x128xf32>
    %337 = tpu.matmul %336, %3, %cst_93 {dimension_numbers = #tpu.dot_dimension_numbers<[1], [0], [0], [1], [0, 0, 1, 1], [], []>} : vector<8x32xbf16>, vector<32x128xbf16>, vector<8x128xf32> -> vector<8x128xf32>
    %338 = arith.truncf %311 : vector<8x32xf32> to vector<8x32xbf16>
    %cst_94 = arith.constant dense<0.000000e+00> : vector<8x128xf32>
    %339 = tpu.matmul %338, %5, %cst_94 {dimension_numbers = #tpu.dot_dimension_numbers<[1], [0], [0], [1], [0, 0, 1, 1], [], []>} : vector<8x32xbf16>, vector<32x128xbf16>, vector<8x128xf32> -> vector<8x128xf32>
    %340 = arith.addf %337, %339 : vector<8x128xf32>
    %341 = vector.broadcast %6 : vector<1x128xf32> to vector<8x128xf32>
    %342 = arith.addf %340, %341 : vector<8x128xf32>
    %343 = arith.negf %342 : vector<8x128xf32>
    %344 = math.exp %343 : vector<8x128xf32>
    %cst_95 = arith.constant 1.000000e+00 : f32
    %345 = vector.broadcast %cst_95 : f32 to vector<8x128xf32>
    %346 = arith.addf %345, %344 : vector<8x128xf32>
    %347 = arith.divf %345, %346 : vector<8x128xf32>
    %348 = vector.extract_strided_slice %347 {offsets = [0, 0], sizes = [8, 32], strides = [1, 1]} : vector<8x128xf32> to vector<8x32xf32>
    %349 = vector.extract_strided_slice %347 {offsets = [0, 32], sizes = [8, 32], strides = [1, 1]} : vector<8x128xf32> to vector<8x32xf32>
    %350 = vector.extract_strided_slice %347 {offsets = [0, 64], sizes = [8, 32], strides = [1, 1]} : vector<8x128xf32> to vector<8x32xf32>
    %cst_96 = arith.constant 2.000000e+00 : f32
    %351 = vector.broadcast %cst_96 : f32 to vector<8x32xf32>
    %352 = arith.mulf %351, %350 : vector<8x32xf32>
    %cst_97 = arith.constant 1.000000e+00 : f32
    %353 = vector.broadcast %cst_97 : f32 to vector<8x32xf32>
    %354 = arith.subf %352, %353 : vector<8x32xf32>
    %355 = vector.extract_strided_slice %347 {offsets = [0, 96], sizes = [8, 32], strides = [1, 1]} : vector<8x128xf32> to vector<8x32xf32>
    %356 = arith.mulf %349, %309 : vector<8x32xf32>
    %357 = arith.mulf %348, %354 : vector<8x32xf32>
    %358 = arith.addf %356, %357 : vector<8x32xf32>
    %359 = math.tanh %358 : vector<8x32xf32>
    %360 = arith.mulf %355, %359 : vector<8x32xf32>
    %c7_i32 = arith.constant 7 : i32
    %361 = arith.index_cast %c7_i32 : i32 to index
    %c0_98 = arith.constant 0 : index
    %c0_99 = arith.constant 0 : index
    %362 = vector.load %arg0[%361, %c0_98, %c0_99] : memref<8x8x128xf32, #tpu.memory_space<vmem>>, vector<1x8x128xf32>
    %363 = vector.shape_cast %362 : vector<1x8x128xf32> to vector<8x128xf32>
    %364 = arith.truncf %335 : vector<8x32xf32> to vector<8x32xbf16>
    %cst_100 = arith.constant dense<0.000000e+00> : vector<8x128xf32>
    %365 = tpu.matmul %364, %1, %cst_100 {dimension_numbers = #tpu.dot_dimension_numbers<[1], [0], [0], [1], [0, 0, 1, 1], [], []>} : vector<8x32xbf16>, vector<32x128xbf16>, vector<8x128xf32> -> vector<8x128xf32>
    %366 = arith.addf %363, %365 : vector<8x128xf32>
    %367 = arith.negf %366 : vector<8x128xf32>
    %368 = math.exp %367 : vector<8x128xf32>
    %cst_101 = arith.constant 1.000000e+00 : f32
    %369 = vector.broadcast %cst_101 : f32 to vector<8x128xf32>
    %370 = arith.addf %369, %368 : vector<8x128xf32>
    %371 = arith.divf %369, %370 : vector<8x128xf32>
    %372 = vector.extract_strided_slice %371 {offsets = [0, 0], sizes = [8, 32], strides = [1, 1]} : vector<8x128xf32> to vector<8x32xf32>
    %373 = vector.extract_strided_slice %371 {offsets = [0, 32], sizes = [8, 32], strides = [1, 1]} : vector<8x128xf32> to vector<8x32xf32>
    %374 = vector.extract_strided_slice %371 {offsets = [0, 64], sizes = [8, 32], strides = [1, 1]} : vector<8x128xf32> to vector<8x32xf32>
    %cst_102 = arith.constant 2.000000e+00 : f32
    %375 = vector.broadcast %cst_102 : f32 to vector<8x32xf32>
    %376 = arith.mulf %375, %374 : vector<8x32xf32>
    %cst_103 = arith.constant 1.000000e+00 : f32
    %377 = vector.broadcast %cst_103 : f32 to vector<8x32xf32>
    %378 = arith.subf %376, %377 : vector<8x32xf32>
    %379 = vector.extract_strided_slice %371 {offsets = [0, 96], sizes = [8, 32], strides = [1, 1]} : vector<8x128xf32> to vector<8x32xf32>
    %380 = arith.mulf %373, %333 : vector<8x32xf32>
    %381 = arith.mulf %372, %378 : vector<8x32xf32>
    %382 = arith.addf %380, %381 : vector<8x32xf32>
    %383 = math.tanh %382 : vector<8x32xf32>
    %384 = arith.mulf %379, %383 : vector<8x32xf32>
    %385 = arith.truncf %384 : vector<8x32xf32> to vector<8x32xbf16>
    %cst_104 = arith.constant dense<0.000000e+00> : vector<8x128xf32>
    %386 = tpu.matmul %385, %3, %cst_104 {dimension_numbers = #tpu.dot_dimension_numbers<[1], [0], [0], [1], [0, 0, 1, 1], [], []>} : vector<8x32xbf16>, vector<32x128xbf16>, vector<8x128xf32> -> vector<8x128xf32>
    %387 = arith.truncf %360 : vector<8x32xf32> to vector<8x32xbf16>
    %cst_105 = arith.constant dense<0.000000e+00> : vector<8x128xf32>
    %388 = tpu.matmul %387, %5, %cst_105 {dimension_numbers = #tpu.dot_dimension_numbers<[1], [0], [0], [1], [0, 0, 1, 1], [], []>} : vector<8x32xbf16>, vector<32x128xbf16>, vector<8x128xf32> -> vector<8x128xf32>
    %389 = arith.addf %386, %388 : vector<8x128xf32>
    %390 = vector.broadcast %6 : vector<1x128xf32> to vector<8x128xf32>
    %391 = arith.addf %389, %390 : vector<8x128xf32>
    %392 = arith.negf %391 : vector<8x128xf32>
    %393 = math.exp %392 : vector<8x128xf32>
    %cst_106 = arith.constant 1.000000e+00 : f32
    %394 = vector.broadcast %cst_106 : f32 to vector<8x128xf32>
    %395 = arith.addf %394, %393 : vector<8x128xf32>
    %396 = arith.divf %394, %395 : vector<8x128xf32>
    %397 = vector.extract_strided_slice %396 {offsets = [0, 0], sizes = [8, 32], strides = [1, 1]} : vector<8x128xf32> to vector<8x32xf32>
    %398 = vector.extract_strided_slice %396 {offsets = [0, 32], sizes = [8, 32], strides = [1, 1]} : vector<8x128xf32> to vector<8x32xf32>
    %399 = vector.extract_strided_slice %396 {offsets = [0, 64], sizes = [8, 32], strides = [1, 1]} : vector<8x128xf32> to vector<8x32xf32>
    %cst_107 = arith.constant 2.000000e+00 : f32
    %400 = vector.broadcast %cst_107 : f32 to vector<8x32xf32>
    %401 = arith.mulf %400, %399 : vector<8x32xf32>
    %cst_108 = arith.constant 1.000000e+00 : f32
    %402 = vector.broadcast %cst_108 : f32 to vector<8x32xf32>
    %403 = arith.subf %401, %402 : vector<8x32xf32>
    %404 = vector.extract_strided_slice %396 {offsets = [0, 96], sizes = [8, 32], strides = [1, 1]} : vector<8x128xf32> to vector<8x32xf32>
    %405 = arith.mulf %398, %358 : vector<8x32xf32>
    %406 = arith.mulf %397, %403 : vector<8x32xf32>
    %407 = arith.addf %405, %406 : vector<8x32xf32>
    %408 = math.tanh %407 : vector<8x32xf32>
    %409 = arith.mulf %404, %408 : vector<8x32xf32>
    %c8_i32 = arith.constant 8 : i32
    %410 = arith.truncf %409 : vector<8x32xf32> to vector<8x32xbf16>
    %cst_109 = arith.constant dense<0.000000e+00> : vector<8x128xf32>
    %411 = tpu.matmul %410, %8, %cst_109 {dimension_numbers = #tpu.dot_dimension_numbers<[1], [0], [0], [1], [0, 0, 1, 1], [], []>} : vector<8x32xbf16>, vector<32x128xbf16>, vector<8x128xf32> -> vector<8x128xf32>
    %412 = vector.broadcast %9 : vector<1x128xf32> to vector<8x128xf32>
    %413 = arith.addf %411, %412 : vector<8x128xf32>
    %c0_110 = arith.constant 0 : index
    %c0_111 = arith.constant 0 : index
    %414 = vector.load %arg9[%c0_110, %c0_111] : memref<8x128xf32, #tpu.memory_space<vmem>>, vector<8x128xf32>
    tpu.vector_store %arg9[%c0_110, %c0_111], %413 {strides = array<i32>} : memref<8x128xf32, #tpu.memory_space<vmem>>, vector<8x128xf32>,
    return
  }
}

</mosaic_0001>

<bundles_post_ra>
// kernel: lstm_forward.1
= control target key start
LH: loop header
LB: loop body
LE: loop exit
PB: predicated region body
PF: predicated region fallthrough
CT: control target
= control target key end

     0   :  { %v2086_v0 = vmov 0.0   ;;  %vm2087_vm0 = vmmov 0   ;;  %vm67_vm1 = vcmask 261120   ;;  %s2088_s20 = smov 64   ;;  %s2089_s23 = smov 32   ;;  %s2548_s3 = inlined_call_operand.vmem [shape: f32[32,128], index: 3, kind: input, shape index: {}]   ;;  %s2549_s1 = inlined_call_operand.vmem [shape: f32[2,8,32], index: 1, kind: input, shape index: {}]   ;;  %s2550_s0 = inlined_call_operand.vmem [shape: f32[8,8,128], index: 0, kind: input, shape index: {}]   ;;  %s2551_s2 = inlined_call_operand.vmem [shape: f32[2,8,32], index: 2, kind: input, shape index: {}]   ;;  %s2552_s5 = inlined_call_operand.vmem [shape: f32[32,128], index: 5, kind: input, shape index: {}]   ;;  %s2553_s4 = inlined_call_operand.vmem [shape: f32[32,128], index: 4, kind: input, shape index: {}]   ;;  %s2554_s6 = inlined_call_operand.vmem [shape: f32[1,128], index: 6, kind: input, shape index: {}]   ;;  %s2555_s7 = inlined_call_operand.vmem [shape: f32[32,128], index: 7, kind: input, shape index: {}]   ;;  %s2556_s8 = inlined_call_operand.vmem [shape: f32[1,128], index: 8, kind: input, shape index: {}]   ;;  %s2557_s9 = inlined_call_operand.vmem [shape: f32[8,128], index: 9, kind: output, shape index: {}]  }
   0x1   :  { %1785 = vmatprep.subr.bf16.mxu0 %v2086_v0  ;;  %v33_v1 = vld [vmem:[%s2548_s3] sm:$0xff]  ;;  %v34_v2 = vld [vmem:[%s2548_s3 + $0x8] sm:$0xff]  ;;  %v35_v3 = vld [vmem:[%s2548_s3 + $0x10] sm:$0xff]  ;;  %1789 = vmatprep.mubr.msk.bf16.mxu0 %vm2087_vm0, %v2086_v0 }
   0x2   :  { %v2152_v4 = vpack.c.bf16 %v34_v2, %v33_v1  ;;  %v36_v5 = vld [vmem:[%s2548_s3 + $0x18] sm:$0xff]  ;;  %1793 = vmatprep.subr.bf16.mxu1 %v2086_v0  ;;  %1797 = vmatprep.mubr.msk.bf16.mxu1 %vm2087_vm0, %v2086_v0  ;;  %v59_v7 = vld [vmem:[%s2549_s1] sm:$0xff]  ;;  %v46_v29 = vld [vmem:[%s2552_s5 + $0x8] sm:$0xff] }
   0x3   :  { %v2161_v6 = vpack.c.bf16 %v36_v5, %v35_v3  ;;  %v66_v8 = vpack.c.bf16 %v59_v7, %v59_v7  ;;  %v65_v9 = vld [vmem:[%s2550_s0] sm:$0xff]  ;;  %v47_v30 = vld [vmem:[%s2552_s5 + $0x10] sm:$0xff]  ;;  %v48_v32 = vld [vmem:[%s2552_s5 + $0x18] sm:$0xff] }
   0x4   :  { %1786 = vmatpush3.bf16.msra.mxu0 %v2152_v4  ;;  %v62_v21 = vld [vmem:[%s2551_s2] sm:$0xff]  ;;  %v40_v34 = vld [vmem:[%s2553_s4 + $0x8] sm:$0xff]  ;;  %v41_v36 = vld [vmem:[%s2553_s4 + $0x10] sm:$0xff]  ;;  %v2213_v38 = vpack.c.bf16 %v48_v32, %v47_v30 }
   0x5   :  { %1787 = vmatprep.subr.bf16.mxu0 %v2086_v0  ;;  %v45_v28 = vld [vmem:[%s2552_s5] sm:$0xff]  ;;  %v42_v37 = vld [vmem:[%s2553_s4 + $0x18] sm:$0xff]  ;;  %v1642_v39 = vld [vmem:[%s2549_s1 + $0x8] sm:$0xff] }
   0x6   :  { %v2193_v31 = vpack.c.bf16 %v46_v29, %v45_v28  ;;  %v39_v33 = vld [vmem:[%s2553_s4] sm:$0xff]  ;;  %v2221_v40 = vpack.c.bf16 %v42_v37, %v41_v36  ;;  %v142_v41 = vpack.c.bf16 %v1642_v39, %v1642_v39  ;;  %v1652_v51 = vld [vmem:[%s2550_s0 + $0x8] sm:$0xff] }
   0x7   :  { %v2204_v35 = vpack.c.bf16 %v40_v34, %v39_v33  ;;  %v2256_v52 = vld [vmem:[%s2554_s6] ss:$0 sm:$0xff] }
   0x8   :  { %1788 = vmatpush3.bf16.msra.mxu0 %v2161_v6  ;;  %1794 = vmatpush3.bf16.msra.mxu1 %v2193_v31 }
   0x9   :  { %1801 = vmatprep.subr.bf16.mxu0 %v2086_v0  ;;  %1795 = vmatprep.subr.bf16.mxu1 %v2086_v0 }
   0xb   :  { %1790 = vmatmul.mubr.msk.bf16.vlgmr.msra.gmra.mrb[0].mxu0 %vm67_vm1, %v66_v8 }
   0xc   :  { %1805 = vmatprep.mubr.msk.bf16.mxu0 %vm2087_vm0, %v2086_v0  ;;  %1802 = vmatpush3.bf16.msra.mxu0 %v2204_v35 }
   0xd   :  { %1803 = vmatprep.subr.bf16.mxu0 %v2086_v0  ;;  %1796 = vmatpush3.bf16.msra.mxu1 %v2213_v38 }
   0xe   :  { %1809 = vmatprep.subr.bf16.mxu1 %v2086_v0 }
  0x10   :  { %1804 = vmatpush3.bf16.msra.mxu0 %v2221_v40  ;;  %1798 = vmatmul.mubr.msk.bf16.vlgmr.msra.gmra.mrb[0].mxu1 %vm67_vm1, %v142_v41 }
  0x11   :  { %1817 = vmatprep.subr.bf16.mxu0 %v2086_v0  ;;  %1810 = vmatpush3.bf16.msra.mxu1 %v2152_v4 }
  0x12   :  { %1813 = vmatprep.mubr.msk.bf16.mxu1 %vm2087_vm0, %v2086_v0  ;;  %1811 = vmatprep.subr.bf16.mxu1 %v2086_v0 }
  0x15   :  { %1812 = vmatpush3.bf16.msra.mxu1 %v2161_v6 }
  0x16   :  { %1825 = vmatprep.subr.bf16.mxu1 %v2086_v0 }
  0xde   :  { %v105_v10 = vpop.f32.mrb[0].mxu0 }
  0xdf   :  { %v111_v11 = vadd.f32 %v105_v10, %v65_v9  ;;  %v1791_v12 = vpop.f32.mrb[1].mxu0 }
  0xe0   :  { %v108_v13 = vpop.f32.mrb[2].mxu0 }
  0xe1   :  { %v1645_v14 = vmul.f32 -1.442695, %v111_v11  ;;  %v1792_v15 = vpop.f32.mrb[3].mxu0 }
  0xe2   :  { %v1643_v15 = vld [vmem:[%s2551_s2 + $0x8] sm:$0xff] }
  0xe3   :  { %1989 = vpow2.f32 %v1645_v14  ;;  %v180_v46 = vpop.f32.mrb[0].mxu1 }
  0xe4   :  { %v1799_v47 = vpop.f32.mrb[1].mxu1 }
  0xe5   :  { %v183_v48 = vpop.f32.mrb[2].mxu1 }
  0xe6   :  { %v1800_v49 = vpop.f32.mrb[3].mxu1 }
  0xed   :  { %v1990_v16 = vpop.eup %1989 }
  0xee   :  { %v115_v17 = vadd.f32 1.0, %v1990_v16 }
  0xf0   :  { %1991 = vrcp.f32 %v115_v17 }
  0xfa   :  { %v1992_v18 = vpop.eup %1991 }
  0xfb   :  { %v118_v19 = vmul.f32 2.0, %v1992_v18 }
  0xfd   :  { %v1646_v20 = vadd.f32 -1.0, %v118_v19 }
  0xff   :  { %126 = vrot.lane.b32.xlu0 %v1646_v20, %s2088_s20 }
 0x103   :  { %121 = vrot.lane.b32.xlu0 %v62_v21, %s2089_s23 }
 0x171   :  { %v127_v22 = vpop.permute.xlu0 %126 }
 0x172   :  { %v129_v23 = vmul.f32 %v1992_v18, %v127_v22 }
 0x174   :  { %131 = vrot.lane.b32.xlu1 %v129_v23, %s2089_s23 }
 0x175   :  { %v122_v24 = vpop.permute.xlu0 %121 }
 0x176   :  { %v124_v25 = vmul.f32 %v1992_v18, %v122_v24 }
 0x1e6   :  { %v132_v26 = vpop.permute.xlu1 %131 }
 0x1e7   :  { %v2181_v27 = vadd.f32 %v132_v26, %v124_v25 }
 0x1e9   :  { %1993 = vtanh.f32 %v2181_v27 }
 0x1f3   :  { %v1994_v42 = vpop.eup %1993 }
 0x1f4   :  { %137 = vrot.lane.b32.xlu1 %v1994_v42, %s2088_s20 }
 0x266   :  { %v138_v43 = vpop.permute.xlu1 %137 }
 0x267   :  { %v140_v44 = vmul.f32 %v1992_v18, %v138_v43 }
 0x269   :  { %v141_v45 = vpack.c.bf16 %v140_v44, %v140_v44 }
 0x26b   :  { %187 = vrot.lane.b32.xlu0 %v141_v45, %s2089_s23 }
 0x2dd   :  { %v188_v50 = vpop.permute.xlu0 %187 }
 0x2de   :  { %1806 = vmatmul.mubr.msk.bf16.vlgmr.msra.gmra.mrb[4].mxu0 %vm67_vm1, %v188_v50  ;;  %1814 = vmatmul.mubr.msk.bf16.vlgmr.msra.gmra.mrb[4].mxu1 %vm67_vm1, %v188_v50 }
 0x2df   :  { %1826 = vmatpush3.bf16.msra.mxu1 %v2204_v35  ;;  %1818 = vmatpush3.bf16.msra.mxu0 %v2193_v31 }
 0x2e0   :  { %1827 = vmatprep.subr.bf16.mxu1 %v2086_v0  ;;  %1819 = vmatprep.subr.bf16.mxu0 %v2086_v0 }
 0x2e1   :  { %1829 = vmatprep.mubr.msk.bf16.mxu1 %vm2087_vm0, %v2086_v0  ;;  %1821 = vmatprep.mubr.msk.bf16.mxu0 %vm2087_vm0, %v2086_v0 }
 0x2e3   :  { %1828 = vmatpush3.bf16.msra.mxu1 %v2221_v40  ;;  %1820 = vmatpush3.bf16.msra.mxu0 %v2213_v38 }
 0x2e4   :  { %1833 = vmatprep.subr.bf16.mxu0 %v2086_v0  ;;  %1841 = vmatprep.subr.bf16.mxu1 %v2086_v0 }
 0x3b1   :  { %v226_v53 = vpop.f32.mrb[4].mxu0  ;;  %v304_v54 = vpop.f32.mrb[4].mxu1 }
 0x3b2   :  { %v227_v55 = vadd.f32 %v226_v53, %v180_v46  ;;  %v310_v56 = vadd.f32 %v1652_v51, %v304_v54  ;;  %v1807_v57 = vpop.f32.mrb[5].mxu0  ;;  %v1815_v58 = vpop.f32.mrb[5].mxu1  ;;  %v1660_v53 = vld [vmem:[%s2550_s0 + $0x10] sm:$0xff] }
 0x3b3   :  { %v229_v59 = vpop.f32.mrb[6].mxu0  ;;  %v307_v60 = vpop.f32.mrb[6].mxu1 }
 0x3b4   :  { %v238_v61 = vadd.f32 %v2256_v52, %v227_v55  ;;  %v1654_v62 = vmul.f32 -1.442695, %v310_v56  ;;  %v1808_v63 = vpop.f32.mrb[7].mxu0  ;;  %v1816_v1 = vpop.f32.mrb[7].mxu1 }
 0x3b6   :  { %v1650_v2 = vmul.f32 -1.442695, %v238_v61  ;;  %1995 = vpow2.f32 %v1654_v62 }
 0x3b8   :  { %1997 = vpow2.f32 %v1650_v2 }
 0x3c0   :  { %v1996_v3 = vpop.eup %1995 }
 0x3c1   :  { %v314_v5 = vadd.f32 1.0, %v1996_v3 }
 0x3c2   :  { %v1998_v7 = vpop.eup %1997 }
 0x3c3   :  { %v242_v8 = vadd.f32 1.0, %v1998_v7  ;;  %1999 = vrcp.f32 %v314_v5 }
 0x3c5   :  { %2001 = vrcp.f32 %v242_v8 }
 0x3cd   :  { %v2000_v9 = vpop.eup %1999 }
 0x3ce   :  { %v317_v10 = vmul.f32 2.0, %v2000_v9  ;;  %v319_v21 = vmul.f32 %v2000_v9, %v2181_v27 }
 0x3cf   :  { %v2002_v11 = vpop.eup %2001 }
 0x3d0   :  { %v1655_v12 = vadd.f32 -1.0, %v317_v10  ;;  %v245_v13 = vmul.f32 2.0, %v2002_v11 }
 0x3d2   :  { %321 = vrot.lane.b32.xlu0 %v1655_v12, %s2088_s20  ;;  %v1651_v14 = vadd.f32 -1.0, %v245_v13 }
 0x3d4   :  { %253 = vrot.lane.b32.xlu1 %v1651_v14, %s2088_s20 }
 0x3d8   :  { %248 = vrot.lane.b32.xlu1 %v1643_v15, %s2089_s23 }
 0x444   :  { %v322_v16 = vpop.permute.xlu0 %321 }
 0x445   :  { %v324_v17 = vmul.f32 %v2000_v9, %v322_v16 }
 0x446   :  { %v254_v18 = vpop.permute.xlu1 %253 }
 0x447   :  { %v256_v19 = vmul.f32 %v2002_v11, %v254_v18  ;;  %326 = vrot.lane.b32.xlu1 %v324_v17, %s2089_s23 }
 0x449   :  { %258 = vrot.lane.b32.xlu0 %v256_v19, %s2089_s23 }
 0x44a   :  { %v249_v20 = vpop.permute.xlu1 %248 }
 0x44b   :  { %v251_v23 = vmul.f32 %v2002_v11, %v249_v20 }
 0x4b9   :  { %v327_v22 = vpop.permute.xlu1 %326 }
 0x4ba   :  { %v2268_v24 = vadd.f32 %v327_v22, %v319_v21 }
 0x4bb   :  { %v259_v25 = vpop.permute.xlu0 %258 }
 0x4bc   :  { %2003 = vtanh.f32 %v2268_v24  ;;  %v2271_v26 = vadd.f32 %v259_v25, %v251_v23 }
 0x4be   :  { %2005 = vtanh.f32 %v2271_v26 }
 0x4c6   :  { %v2004_v28 = vpop.eup %2003 }
 0x4c7   :  { %332 = vrot.lane.b32.xlu1 %v2004_v28, %s2088_s20 }
 0x4c8   :  { %v2006_v29 = vpop.eup %2005 }
 0x4c9   :  { %264 = vrot.lane.b32.xlu0 %v2006_v29, %s2088_s20 }
 0x539   :  { %v333_v30 = vpop.permute.xlu1 %332 }
 0x53a   :  { %v335_v32 = vmul.f32 %v2000_v9, %v333_v30 }
 0x53b   :  { %v265_v27 = vpop.permute.xlu0 %264 }
 0x53c   :  { %v336_v33 = vpack.c.bf16 %v335_v32, %v335_v32  ;;  %v267_v34 = vmul.f32 %v2002_v11, %v265_v27 }
 0x53e   :  { %v337_v36 = vpack.c.bf16 %v267_v34, %v267_v34  ;;  %385 = vrot.lane.b32.xlu1 %v336_v33, %s2089_s23 }
 0x540   :  { %339 = vrot.lane.b32.xlu0 %v337_v36, %s2089_s23  ;;  %v1668_v36 = vld [vmem:[%s2550_s0 + $0x18] sm:$0xff] }
 0x5b0   :  { %v386_v37 = vpop.permute.xlu1 %385 }
 0x5b1   :  { %1830 = vmatmul.mubr.msk.bf16.vlgmr.msra.gmra.mrb[8].mxu1 %vm67_vm1, %v386_v37 }
 0x5b2   :  { %v340_v39 = vpop.permute.xlu0 %339  ;;  %1842 = vmatpush3.bf16.msra.mxu1 %v2193_v31  ;;  %1845 = vmatprep.mubr.msk.bf16.mxu1 %vm2087_vm0, %v2086_v0 }
 0x5b3   :  { %1822 = vmatmul.mubr.msk.bf16.vlgmr.msra.gmra.mrb[8].mxu0 %vm67_vm1, %v340_v39  ;;  %1843 = vmatprep.subr.bf16.mxu1 %v2086_v0 }
 0x5b4   :  { %1834 = vmatpush3.bf16.msra.mxu0 %v2152_v4  ;;  %1837 = vmatprep.mubr.msk.bf16.mxu0 %vm2087_vm0, %v2086_v0 }
 0x5b5   :  { %1835 = vmatprep.subr.bf16.mxu0 %v2086_v0 }
 0x5b6   :  { %1844 = vmatpush3.bf16.msra.mxu1 %v2213_v38 }
 0x5b7   :  { %1857 = vmatprep.subr.bf16.mxu1 %v2086_v0 }
 0x5b8   :  { %1836 = vmatpush3.bf16.msra.mxu0 %v2161_v6 }
 0x5b9   :  { %1849 = vmatprep.subr.bf16.mxu0 %v2086_v0 }
 0x5bb   :  { %1838 = vmatmul.mubr.msk.bf16.vlgmr.msra.gmra.mrb[12].mxu0 %vm67_vm1, %v386_v37 }
 0x5bc   :  { %1850 = vmatpush3.bf16.msra.mxu0 %v2204_v35  ;;  %1853 = vmatprep.mubr.msk.bf16.mxu0 %vm2087_vm0, %v2086_v0 }
 0x5bd   :  { %1851 = vmatprep.subr.bf16.mxu0 %v2086_v0 }
 0x5c0   :  { %1852 = vmatpush3.bf16.msra.mxu0 %v2221_v40 }
 0x5c1   :  { %1865 = vmatprep.subr.bf16.mxu0 %v2086_v0 }
 0x684   :  { %v424_v41 = vpop.f32.mrb[8].mxu1 }
 0x685   :  { %v1831_v42 = vpop.f32.mrb[9].mxu1 }
 0x686   :  { %v378_v43 = vpop.f32.mrb[8].mxu0  ;;  %v427_v44 = vpop.f32.mrb[10].mxu1 }
 0x687   :  { %v425_v45 = vadd.f32 %v424_v41, %v378_v43  ;;  %v1823_v46 = vpop.f32.mrb[9].mxu0  ;;  %v1832_v47 = vpop.f32.mrb[11].mxu1 }
 0x688   :  { %v381_v48 = vpop.f32.mrb[10].mxu0 }
 0x689   :  { %v430_v49 = vadd.f32 %v2256_v52, %v425_v45  ;;  %v1824_v50 = vpop.f32.mrb[11].mxu0 }
 0x68b   :  { %v1658_v51 = vmul.f32 -1.442695, %v430_v49 }
 0x68d   :  { %2007 = vpow2.f32 %v1658_v51 }
 0x68e   :  { %v492_v54 = vpop.f32.mrb[12].mxu0 }
 0x68f   :  { %v498_v55 = vadd.f32 %v1660_v53, %v492_v54  ;;  %v1839_v56 = vpop.f32.mrb[13].mxu0 }
 0x690   :  { %v495_v57 = vpop.f32.mrb[14].mxu0 }
 0x691   :  { %v1662_v58 = vmul.f32 -1.442695, %v498_v55  ;;  %v1840_v59 = vpop.f32.mrb[15].mxu0 }
 0x693   :  { %2009 = vpow2.f32 %v1662_v58 }
 0x697   :  { %v2008_v60 = vpop.eup %2007 }
 0x698   :  { %v434_v61 = vadd.f32 1.0, %v2008_v60 }
 0x69a   :  { %2011 = vrcp.f32 %v434_v61 }
 0x69d   :  { %v2010_v62 = vpop.eup %2009 }
 0x69e   :  { %v502_v63 = vadd.f32 1.0, %v2010_v62 }
 0x6a0   :  { %2013 = vrcp.f32 %v502_v63 }
 0x6a4   :  { %v2012_v1 = vpop.eup %2011 }
 0x6a5   :  { %v437_v2 = vmul.f32 2.0, %v2012_v1  ;;  %v439_v13 = vmul.f32 %v2012_v1, %v2271_v26 }
 0x6a7   :  { %v1659_v3 = vadd.f32 -1.0, %v437_v2 }
 0x6a9   :  { %441 = vrot.lane.b32.xlu0 %v1659_v3, %s2088_s20 }
 0x6aa   :  { %v2014_v5 = vpop.eup %2013 }
 0x6ab   :  { %v505_v7 = vmul.f32 2.0, %v2014_v5  ;;  %v507_v16 = vmul.f32 %v2014_v5, %v2268_v24 }
 0x6ad   :  { %v1663_v8 = vadd.f32 -1.0, %v505_v7 }
 0x6af   :  { %509 = vrot.lane.b32.xlu1 %v1663_v8, %s2088_s20 }
 0x71b   :  { %v442_v9 = vpop.permute.xlu0 %441 }
 0x71c   :  { %v444_v10 = vmul.f32 %v2012_v1, %v442_v9 }
 0x71e   :  { %446 = vrot.lane.b32.xlu0 %v444_v10, %s2089_s23 }
 0x721   :  { %v510_v11 = vpop.permute.xlu1 %509 }
 0x722   :  { %v512_v12 = vmul.f32 %v2014_v5, %v510_v11 }
 0x724   :  { %514 = vrot.lane.b32.xlu1 %v512_v12, %s2089_s23 }
 0x790   :  { %v447_v14 = vpop.permute.xlu0 %446 }
 0x791   :  { %v2308_v15 = vadd.f32 %v447_v14, %v439_v13 }
 0x793   :  { %2015 = vtanh.f32 %v2308_v15 }
 0x796   :  { %v515_v17 = vpop.permute.xlu1 %514 }
 0x797   :  { %v2312_v18 = vadd.f32 %v515_v17, %v507_v16 }
 0x799   :  { %2017 = vtanh.f32 %v2312_v18 }
 0x79d   :  { %v2016_v19 = vpop.eup %2015 }
 0x79e   :  { %452 = vrot.lane.b32.xlu0 %v2016_v19, %s2088_s20 }
 0x7a3   :  { %v2018_v20 = vpop.eup %2017 }
 0x7a4   :  { %520 = vrot.lane.b32.xlu1 %v2018_v20, %s2088_s20 }
 0x810   :  { %v453_v21 = vpop.permute.xlu0 %452 }
 0x811   :  { %v455_v22 = vmul.f32 %v2012_v1, %v453_v21 }
 0x813   :  { %v525_v23 = vpack.c.bf16 %v455_v22, %v455_v22 }
 0x815   :  { %527 = vrot.lane.b32.xlu0 %v525_v23, %s2089_s23 }
 0x816   :  { %v521_v25 = vpop.permute.xlu1 %520 }
 0x817   :  { %v523_v26 = vmul.f32 %v2014_v5, %v521_v25 }
 0x819   :  { %v524_v28 = vpack.c.bf16 %v523_v26, %v523_v26 }
 0x81b   :  { %573 = vrot.lane.b32.xlu1 %v524_v28, %s2089_s23 }
 0x887   :  { %v528_v24 = vpop.permute.xlu0 %527 }
 0x888   :  { %1846 = vmatmul.mubr.msk.bf16.vlgmr.msra.gmra.mrb[12].mxu1 %vm67_vm1, %v528_v24 }
 0x889   :  { %1858 = vmatpush3.bf16.msra.mxu1 %v2152_v4  ;;  %1861 = vmatprep.mubr.msk.bf16.mxu1 %vm2087_vm0, %v2086_v0 }
 0x88a   :  { %1859 = vmatprep.subr.bf16.mxu1 %v2086_v0 }
 0x88d   :  { %1860 = vmatpush3.bf16.msra.mxu1 %v2161_v6  ;;  %v574_v29 = vpop.permute.xlu1 %573 }
 0x88e   :  { %1854 = vmatmul.mubr.msk.bf16.vlgmr.msra.gmra.mrb[16].mxu0 %vm67_vm1, %v574_v29  ;;  %1873 = vmatprep.subr.bf16.mxu1 %v2086_v0 }
 0x88f   :  { %1866 = vmatpush3.bf16.msra.mxu0 %v2193_v31  ;;  %1869 = vmatprep.mubr.msk.bf16.mxu0 %vm2087_vm0, %v2086_v0 }
 0x890   :  { %1862 = vmatmul.mubr.msk.bf16.vlgmr.msra.gmra.mrb[16].mxu1 %vm67_vm1, %v574_v29  ;;  %1867 = vmatprep.subr.bf16.mxu0 %v2086_v0 }
 0x891   :  { %1874 = vmatpush3.bf16.msra.mxu1 %v2204_v35  ;;  %1877 = vmatprep.mubr.msk.bf16.mxu1 %vm2087_vm0, %v2086_v0 }
 0x892   :  { %1875 = vmatprep.subr.bf16.mxu1 %v2086_v0 }
 0x893   :  { %1868 = vmatpush3.bf16.msra.mxu0 %v2213_v38 }
 0x894   :  { %1881 = vmatprep.subr.bf16.mxu0 %v2086_v0 }
 0x895   :  { %1876 = vmatpush3.bf16.msra.mxu1 %v2221_v40 }
 0x896   :  { %1889 = vmatprep.subr.bf16.mxu1 %v2086_v0 }
 0x95b   :  { %v566_v30 = vpop.f32.mrb[12].mxu1 }
 0x95c   :  { %v1847_v32 = vpop.f32.mrb[13].mxu1 }
 0x95d   :  { %v569_v27 = vpop.f32.mrb[14].mxu1 }
 0x95e   :  { %v1848_v33 = vpop.f32.mrb[15].mxu1 }
 0x95f   :  { %v1676_v33 = vld [vmem:[%s2550_s0 + $0x20] sm:$0xff] }
 0x961   :  { %v612_v34 = vpop.f32.mrb[16].mxu0 }
 0x962   :  { %v613_v37 = vadd.f32 %v612_v34, %v566_v30  ;;  %v1855_v39 = vpop.f32.mrb[17].mxu0 }
 0x963   :  { %v615_v41 = vpop.f32.mrb[18].mxu0  ;;  %v680_v42 = vpop.f32.mrb[16].mxu1 }
 0x964   :  { %v618_v43 = vadd.f32 %v2256_v52, %v613_v37  ;;  %v686_v44 = vadd.f32 %v1668_v36, %v680_v42  ;;  %v1856_v45 = vpop.f32.mrb[19].mxu0  ;;  %v1863_v46 = vpop.f32.mrb[17].mxu1 }
 0x965   :  { %v683_v47 = vpop.f32.mrb[18].mxu1 }
 0x966   :  { %v1666_v48 = vmul.f32 -1.442695, %v618_v43  ;;  %v1670_v49 = vmul.f32 -1.442695, %v686_v44  ;;  %v1864_v50 = vpop.f32.mrb[19].mxu1 }
 0x968   :  { %2019 = vpow2.f32 %v1666_v48 }
 0x969   :  { %2021 = vpow2.f32 %v1670_v49 }
 0x972   :  { %v2020_v51 = vpop.eup %2019 }
 0x973   :  { %v2022_v53 = vpop.eup %2021  ;;  %v622_v54 = vadd.f32 1.0, %v2020_v51 }
 0x974   :  { %v690_v55 = vadd.f32 1.0, %v2022_v53 }
 0x975   :  { %2023 = vrcp.f32 %v622_v54 }
 0x976   :  { %2025 = vrcp.f32 %v690_v55 }
 0x97f   :  { %v2024_v56 = vpop.eup %2023 }
 0x980   :  { %v2026_v57 = vpop.eup %2025  ;;  %v625_v58 = vmul.f32 2.0, %v2024_v56  ;;  %v627_v3 = vmul.f32 %v2024_v56, %v2308_v15 }
 0x981   :  { %v693_v59 = vmul.f32 2.0, %v2026_v57  ;;  %v695_v5 = vmul.f32 %v2026_v57, %v2312_v18 }
 0x982   :  { %v1667_v60 = vadd.f32 -1.0, %v625_v58 }
 0x983   :  { %v1671_v61 = vadd.f32 -1.0, %v693_v59 }
 0x984   :  { %629 = vrot.lane.b32.xlu0 %v1667_v60, %s2088_s20 }
 0x985   :  { %697 = vrot.lane.b32.xlu1 %v1671_v61, %s2088_s20 }
 0x9f6   :  { %v630_v62 = vpop.permute.xlu0 %629 }
 0x9f7   :  { %v698_v63 = vpop.permute.xlu1 %697  ;;  %v632_v1 = vmul.f32 %v2024_v56, %v630_v62 }
 0x9f8   :  { %v700_v2 = vmul.f32 %v2026_v57, %v698_v63 }
 0x9f9   :  { %634 = vrot.lane.b32.xlu0 %v632_v1, %s2089_s23 }
 0x9fa   :  { %702 = vrot.lane.b32.xlu1 %v700_v2, %s2089_s23 }
 0xa6b   :  { %v635_v7 = vpop.permute.xlu0 %634 }
 0xa6c   :  { %v703_v8 = vpop.permute.xlu1 %702  ;;  %v2350_v9 = vadd.f32 %v635_v7, %v627_v3 }
 0xa6d   :  { %v2352_v10 = vadd.f32 %v703_v8, %v695_v5 }
 0xa6e   :  { %2027 = vtanh.f32 %v2350_v9 }
 0xa6f   :  { %2029 = vtanh.f32 %v2352_v10 }
 0xa78   :  { %v2028_v11 = vpop.eup %2027 }
 0xa79   :  { %v2030_v12 = vpop.eup %2029  ;;  %640 = vrot.lane.b32.xlu0 %v2028_v11, %s2088_s20 }
 0xa7a   :  { %708 = vrot.lane.b32.xlu1 %v2030_v12, %s2088_s20 }
 0xaeb   :  { %v641_v13 = vpop.permute.xlu0 %640 }
 0xaec   :  { %v709_v14 = vpop.permute.xlu1 %708  ;;  %v643_v15 = vmul.f32 %v2024_v56, %v641_v13 }
 0xaed   :  { %v711_v16 = vmul.f32 %v2026_v57, %v709_v14 }
 0xaee   :  { %v713_v17 = vpack.c.bf16 %v643_v15, %v643_v15 }
 0xaef   :  { %v712_v18 = vpack.c.bf16 %v711_v16, %v711_v16 }
 0xaf0   :  { %715 = vrot.lane.b32.xlu0 %v713_v17, %s2089_s23 }
 0xaf1   :  { %761 = vrot.lane.b32.xlu1 %v712_v18, %s2089_s23 }
 0xb62   :  { %v716_v19 = vpop.permute.xlu0 %715 }
 0xb63   :  { %v762_v20 = vpop.permute.xlu1 %761  ;;  %1870 = vmatmul.mubr.msk.bf16.vlgmr.msra.gmra.mrb[20].mxu0 %vm67_vm1, %v716_v19 }
 0xb64   :  { %1878 = vmatmul.mubr.msk.bf16.vlgmr.msra.gmra.mrb[20].mxu1 %vm67_vm1, %v762_v20  ;;  %1882 = vmatpush3.bf16.msra.mxu0 %v2152_v4 }
 0xb65   :  { %1883 = vmatprep.subr.bf16.mxu0 %v2086_v0  ;;  %1885 = vmatprep.mubr.msk.bf16.mxu0 %vm2087_vm0, %v2086_v0 }
 0xb66   :  { %1890 = vmatpush3.bf16.msra.mxu1 %v2193_v31  ;;  %1893 = vmatprep.mubr.msk.bf16.mxu1 %vm2087_vm0, %v2086_v0 }
 0xb67   :  { %1891 = vmatprep.subr.bf16.mxu1 %v2086_v0 }
 0xb68   :  { %1884 = vmatpush3.bf16.msra.mxu0 %v2161_v6 }
 0xb69   :  { %1897 = vmatprep.subr.bf16.mxu0 %v2086_v0 }
 0xb6a   :  { %1892 = vmatpush3.bf16.msra.mxu1 %v2213_v38 }
 0xb6b   :  { %1886 = vmatmul.mubr.msk.bf16.vlgmr.msra.gmra.mrb[24].mxu0 %vm67_vm1, %v762_v20  ;;  %1905 = vmatprep.subr.bf16.mxu1 %v2086_v0  ;;  %v1684_v20 = vld [vmem:[%s2550_s0 + $0x28] sm:$0xff] }
 0xb6c   :  { %1898 = vmatpush3.bf16.msra.mxu0 %v2204_v35  ;;  %1901 = vmatprep.mubr.msk.bf16.mxu0 %vm2087_vm0, %v2086_v0 }
 0xb6d   :  { %1899 = vmatprep.subr.bf16.mxu0 %v2086_v0 }
 0xb70   :  { %1900 = vmatpush3.bf16.msra.mxu0 %v2221_v40 }
 0xb71   :  { %1913 = vmatprep.subr.bf16.mxu0 %v2086_v0 }
 0xc36   :  { %v754_v21 = vpop.f32.mrb[20].mxu0 }
 0xc37   :  { %v800_v22 = vpop.f32.mrb[20].mxu1  ;;  %v1871_v23 = vpop.f32.mrb[21].mxu0 }
 0xc38   :  { %v801_v25 = vadd.f32 %v800_v22, %v754_v21  ;;  %v1879_v26 = vpop.f32.mrb[21].mxu1  ;;  %v757_v28 = vpop.f32.mrb[22].mxu0 }
 0xc39   :  { %v803_v24 = vpop.f32.mrb[22].mxu1  ;;  %v1872_v29 = vpop.f32.mrb[23].mxu0 }
 0xc3a   :  { %v806_v30 = vadd.f32 %v2256_v52, %v801_v25  ;;  %v1880_v32 = vpop.f32.mrb[23].mxu1 }
 0xc3c   :  { %v1674_v27 = vmul.f32 -1.442695, %v806_v30 }
 0xc3e   :  { %2031 = vpow2.f32 %v1674_v27  ;;  %v868_v34 = vpop.f32.mrb[24].mxu0 }
 0xc3f   :  { %v874_v36 = vadd.f32 %v1676_v33, %v868_v34  ;;  %v1887_v37 = vpop.f32.mrb[25].mxu0 }
 0xc40   :  { %v871_v39 = vpop.f32.mrb[26].mxu0 }
 0xc41   :  { %v1678_v41 = vmul.f32 -1.442695, %v874_v36  ;;  %v1888_v42 = vpop.f32.mrb[27].mxu0 }
 0xc43   :  { %2033 = vpow2.f32 %v1678_v41 }
 0xc48   :  { %v2032_v43 = vpop.eup %2031 }
 0xc49   :  { %v810_v44 = vadd.f32 1.0, %v2032_v43 }
 0xc4b   :  { %2035 = vrcp.f32 %v810_v44 }
 0xc4d   :  { %v2034_v45 = vpop.eup %2033 }
 0xc4e   :  { %v878_v46 = vadd.f32 1.0, %v2034_v45 }
 0xc50   :  { %2037 = vrcp.f32 %v878_v46 }
 0xc55   :  { %v2036_v47 = vpop.eup %2035 }
 0xc56   :  { %v813_v48 = vmul.f32 2.0, %v2036_v47  ;;  %v815_v58 = vmul.f32 %v2036_v47, %v2350_v9 }
 0xc58   :  { %v1675_v49 = vadd.f32 -1.0, %v813_v48 }
 0xc5a   :  { %v2038_v50 = vpop.eup %2037  ;;  %817 = vrot.lane.b32.xlu0 %v1675_v49, %s2088_s20 }
 0xc5b   :  { %v881_v51 = vmul.f32 2.0, %v2038_v50  ;;  %v883_v61 = vmul.f32 %v2038_v50, %v2352_v10 }
 0xc5d   :  { %v1679_v53 = vadd.f32 -1.0, %v881_v51 }
 0xc5f   :  { %885 = vrot.lane.b32.xlu1 %v1679_v53, %s2088_s20 }
 0xccc   :  { %v818_v54 = vpop.permute.xlu0 %817 }
 0xccd   :  { %v820_v55 = vmul.f32 %v2036_v47, %v818_v54 }
 0xccf   :  { %822 = vrot.lane.b32.xlu0 %v820_v55, %s2089_s23 }
 0xcd1   :  { %v886_v56 = vpop.permute.xlu1 %885 }
 0xcd2   :  { %v888_v57 = vmul.f32 %v2038_v50, %v886_v56 }
 0xcd4   :  { %890 = vrot.lane.b32.xlu1 %v888_v57, %s2089_s23 }
 0xd41   :  { %v823_v59 = vpop.permute.xlu0 %822 }
 0xd42   :  { %v2390_v60 = vadd.f32 %v823_v59, %v815_v58 }
 0xd44   :  { %2039 = vtanh.f32 %v2390_v60 }
 0xd46   :  { %v891_v62 = vpop.permute.xlu1 %890 }
 0xd47   :  { %v2394_v63 = vadd.f32 %v891_v62, %v883_v61 }
 0xd49   :  { %2041 = vtanh.f32 %v2394_v63 }
 0xd4e   :  { %v2040_v1 = vpop.eup %2039 }
 0xd4f   :  { %828 = vrot.lane.b32.xlu0 %v2040_v1, %s2088_s20 }
 0xd53   :  { %v2042_v2 = vpop.eup %2041 }
 0xd54   :  { %896 = vrot.lane.b32.xlu1 %v2042_v2, %s2088_s20 }
 0xdc1   :  { %v829_v3 = vpop.permute.xlu0 %828 }
 0xdc2   :  { %v831_v5 = vmul.f32 %v2036_v47, %v829_v3 }
 0xdc4   :  { %v901_v7 = vpack.c.bf16 %v831_v5, %v831_v5 }
 0xdc6   :  { %903 = vrot.lane.b32.xlu0 %v901_v7, %s2089_s23  ;;  %v897_v8 = vpop.permute.xlu1 %896 }
 0xdc7   :  { %v899_v9 = vmul.f32 %v2038_v50, %v897_v8 }
 0xdc9   :  { %v900_v11 = vpack.c.bf16 %v899_v9, %v899_v9 }
 0xdcb   :  { %949 = vrot.lane.b32.xlu1 %v900_v11, %s2089_s23 }
 0xe38   :  { %v904_v10 = vpop.permute.xlu0 %903 }
 0xe39   :  { %1894 = vmatmul.mubr.msk.bf16.vlgmr.msra.gmra.mrb[24].mxu1 %vm67_vm1, %v904_v10 }
 0xe3a   :  { %1906 = vmatpush3.bf16.msra.mxu1 %v2152_v4  ;;  %1909 = vmatprep.mubr.msk.bf16.mxu1 %vm2087_vm0, %v2086_v0 }
 0xe3b   :  { %1907 = vmatprep.subr.bf16.mxu1 %v2086_v0 }
 0xe3d   :  { %v950_v12 = vpop.permute.xlu1 %949 }
 0xe3e   :  { %1908 = vmatpush3.bf16.msra.mxu1 %v2161_v6  ;;  %1902 = vmatmul.mubr.msk.bf16.vlgmr.msra.gmra.mrb[28].mxu0 %vm67_vm1, %v950_v12 }
 0xe3f   :  { %1921 = vmatprep.subr.bf16.mxu1 %v2086_v0  ;;  %1914 = vmatpush3.bf16.msra.mxu0 %v2193_v31 }
 0xe40   :  { %1915 = vmatprep.subr.bf16.mxu0 %v2086_v0  ;;  %1917 = vmatprep.mubr.msk.bf16.mxu0 %vm2087_vm0, %v2086_v0 }
 0xe41   :  { %1910 = vmatmul.mubr.msk.bf16.vlgmr.msra.gmra.mrb[28].mxu1 %vm67_vm1, %v950_v12 }
 0xe42   :  { %1922 = vmatpush3.bf16.msra.mxu1 %v2204_v35  ;;  %1925 = vmatprep.mubr.msk.bf16.mxu1 %vm2087_vm0, %v2086_v0 }
 0xe43   :  { %1923 = vmatprep.subr.bf16.mxu1 %v2086_v0  ;;  %1916 = vmatpush3.bf16.msra.mxu0 %v2213_v38 }
 0xe44   :  { %1929 = vmatprep.subr.bf16.mxu0 %v2086_v0 }
 0xe46   :  { %1924 = vmatpush3.bf16.msra.mxu1 %v2221_v40 }
 0xe47   :  { %1937 = vmatprep.subr.bf16.mxu1 %v2086_v0 }
 0xf0c   :  { %v942_v13 = vpop.f32.mrb[24].mxu1 }
 0xf0d   :  { %v1895_v14 = vpop.f32.mrb[25].mxu1 }
 0xf0e   :  { %v945_v15 = vpop.f32.mrb[26].mxu1 }
 0xf0f   :  { %v1896_v16 = vpop.f32.mrb[27].mxu1 }
 0xf10   :  { %v1692_v16 = vld [vmem:[%s2550_s0 + $0x30] sm:$0xff] }
 0xf11   :  { %v988_v17 = vpop.f32.mrb[28].mxu0 }
 0xf12   :  { %v989_v18 = vadd.f32 %v988_v17, %v942_v13  ;;  %v1903_v19 = vpop.f32.mrb[29].mxu0 }
 0xf13   :  { %v991_v21 = vpop.f32.mrb[30].mxu0 }
 0xf14   :  { %v994_v22 = vadd.f32 %v2256_v52, %v989_v18  ;;  %v1056_v23 = vpop.f32.mrb[28].mxu1  ;;  %v1904_v25 = vpop.f32.mrb[31].mxu0 }
 0xf15   :  { %v1062_v26 = vadd.f32 %v1684_v20, %v1056_v23  ;;  %v1911_v28 = vpop.f32.mrb[29].mxu1 }
 0xf16   :  { %v1682_v24 = vmul.f32 -1.442695, %v994_v22  ;;  %v1059_v29 = vpop.f32.mrb[30].mxu1 }
 0xf17   :  { %v1686_v30 = vmul.f32 -1.442695, %v1062_v26  ;;  %v1912_v32 = vpop.f32.mrb[31].mxu1 }
 0xf18   :  { %2043 = vpow2.f32 %v1682_v24 }
 0xf19   :  { %2045 = vpow2.f32 %v1686_v30 }
 0xf22   :  { %v2044_v27 = vpop.eup %2043 }
 0xf23   :  { %v2046_v33 = vpop.eup %2045  ;;  %v998_v34 = vadd.f32 1.0, %v2044_v27 }
 0xf24   :  { %v1066_v36 = vadd.f32 1.0, %v2046_v33 }
 0xf25   :  { %2047 = vrcp.f32 %v998_v34 }
 0xf26   :  { %2049 = vrcp.f32 %v1066_v36 }
 0xf2f   :  { %v2048_v37 = vpop.eup %2047 }
 0xf30   :  { %v2050_v39 = vpop.eup %2049  ;;  %v1001_v41 = vmul.f32 2.0, %v2048_v37  ;;  %v1003_v49 = vmul.f32 %v2048_v37, %v2390_v60 }
 0xf31   :  { %v1069_v42 = vmul.f32 2.0, %v2050_v39  ;;  %v1071_v50 = vmul.f32 %v2050_v39, %v2394_v63 }
 0xf32   :  { %v1683_v43 = vadd.f32 -1.0, %v1001_v41 }
 0xf33   :  { %v1687_v44 = vadd.f32 -1.0, %v1069_v42 }
 0xf34   :  { %1005 = vrot.lane.b32.xlu0 %v1683_v43, %s2088_s20 }
 0xf35   :  { %1073 = vrot.lane.b32.xlu1 %v1687_v44, %s2088_s20 }
 0xfa6   :  { %v1006_v45 = vpop.permute.xlu0 %1005 }
 0xfa7   :  { %v1074_v46 = vpop.permute.xlu1 %1073  ;;  %v1008_v47 = vmul.f32 %v2048_v37, %v1006_v45 }
 0xfa8   :  { %v1076_v48 = vmul.f32 %v2050_v39, %v1074_v46 }
 0xfa9   :  { %1010 = vrot.lane.b32.xlu0 %v1008_v47, %s2089_s23 }
 0xfaa   :  { %1078 = vrot.lane.b32.xlu1 %v1076_v48, %s2089_s23 }
0x101b   :  { %v1011_v51 = vpop.permute.xlu0 %1010 }
0x101c   :  { %v1079_v53 = vpop.permute.xlu1 %1078  ;;  %v2432_v54 = vadd.f32 %v1011_v51, %v1003_v49 }
0x101d   :  { %v2434_v55 = vadd.f32 %v1079_v53, %v1071_v50 }
0x101e   :  { %2051 = vtanh.f32 %v2432_v54 }
0x101f   :  { %2053 = vtanh.f32 %v2434_v55 }
0x1028   :  { %v2052_v56 = vpop.eup %2051 }
0x1029   :  { %v2054_v57 = vpop.eup %2053  ;;  %1016 = vrot.lane.b32.xlu0 %v2052_v56, %s2088_s20 }
0x102a   :  { %1084 = vrot.lane.b32.xlu1 %v2054_v57, %s2088_s20 }
0x109b   :  { %v1017_v58 = vpop.permute.xlu0 %1016 }
0x109c   :  { %v1085_v59 = vpop.permute.xlu1 %1084  ;;  %v1019_v60 = vmul.f32 %v2048_v37, %v1017_v58 }
0x109d   :  { %v1087_v61 = vmul.f32 %v2050_v39, %v1085_v59 }
0x109e   :  { %v1089_v62 = vpack.c.bf16 %v1019_v60, %v1019_v60 }
0x109f   :  { %v1088_v63 = vpack.c.bf16 %v1087_v61, %v1087_v61 }
0x10a0   :  { %1091 = vrot.lane.b32.xlu0 %v1089_v62, %s2089_s23 }
0x10a1   :  { %1137 = vrot.lane.b32.xlu1 %v1088_v63, %s2089_s23 }
0x1112   :  { %v1092_v1 = vpop.permute.xlu0 %1091 }
0x1113   :  { %v1138_v2 = vpop.permute.xlu1 %1137  ;;  %1918 = vmatmul.mubr.msk.bf16.vlgmr.msra.gmra.mrb[32].mxu0 %vm67_vm1, %v1092_v1 }
0x1114   :  { %1926 = vmatmul.mubr.msk.bf16.vlgmr.msra.gmra.mrb[32].mxu1 %vm67_vm1, %v1138_v2  ;;  %1930 = vmatpush3.bf16.msra.mxu0 %v2152_v4 }
0x1115   :  { %1931 = vmatprep.subr.bf16.mxu0 %v2086_v0  ;;  %1933 = vmatprep.mubr.msk.bf16.mxu0 %vm2087_vm0, %v2086_v0 }
0x1116   :  { %1938 = vmatpush3.bf16.msra.mxu1 %v2193_v31  ;;  %1941 = vmatprep.mubr.msk.bf16.mxu1 %vm2087_vm0, %v2086_v0 }
0x1117   :  { %1939 = vmatprep.subr.bf16.mxu1 %v2086_v0 }
0x1118   :  { %1932 = vmatpush3.bf16.msra.mxu0 %v2161_v6 }
0x1119   :  { %1945 = vmatprep.subr.bf16.mxu0 %v2086_v0 }
0x111a   :  { %1940 = vmatpush3.bf16.msra.mxu1 %v2213_v38 }
0x111b   :  { %1934 = vmatmul.mubr.msk.bf16.vlgmr.msra.gmra.mrb[36].mxu0 %vm67_vm1, %v1138_v2  ;;  %1953 = vmatprep.subr.bf16.mxu1 %v2086_v0 }
0x111c   :  { %1946 = vmatpush3.bf16.msra.mxu0 %v2204_v35  ;;  %1949 = vmatprep.mubr.msk.bf16.mxu0 %vm2087_vm0, %v2086_v0 }
0x111d   :  { %1947 = vmatprep.subr.bf16.mxu0 %v2086_v0 }
0x1120   :  { %1948 = vmatpush3.bf16.msra.mxu0 %v2221_v40 }
0x1121   :  { %1961 = vmatprep.subr.bf16.mxu0 %v2086_v0 }
0x11e6   :  { %v1130_v3 = vpop.f32.mrb[32].mxu0 }
0x11e7   :  { %v1176_v5 = vpop.f32.mrb[32].mxu1  ;;  %v1919_v7 = vpop.f32.mrb[33].mxu0 }
0x11e8   :  { %v1177_v8 = vadd.f32 %v1176_v5, %v1130_v3  ;;  %v1927_v9 = vpop.f32.mrb[33].mxu1  ;;  %v1133_v11 = vpop.f32.mrb[34].mxu0 }
0x11e9   :  { %v1179_v10 = vpop.f32.mrb[34].mxu1  ;;  %v1920_v12 = vpop.f32.mrb[35].mxu0 }
0x11ea   :  { %v1182_v13 = vadd.f32 %v2256_v52, %v1177_v8  ;;  %v1928_v14 = vpop.f32.mrb[35].mxu1 }
0x11ec   :  { %v1690_v15 = vmul.f32 -1.442695, %v1182_v13 }
0x11ee   :  { %2055 = vpow2.f32 %v1690_v15  ;;  %v1244_v17 = vpop.f32.mrb[36].mxu0 }
0x11ef   :  { %v1250_v18 = vadd.f32 %v1692_v16, %v1244_v17  ;;  %v1935_v19 = vpop.f32.mrb[37].mxu0 }
0x11f0   :  { %v1247_v20 = vpop.f32.mrb[38].mxu0 }
0x11f1   :  { %v1694_v21 = vmul.f32 -1.442695, %v1250_v18  ;;  %v1936_v22 = vpop.f32.mrb[39].mxu0 }
0x11f3   :  { %2057 = vpow2.f32 %v1694_v21 }
0x11f8   :  { %v2056_v23 = vpop.eup %2055 }
0x11f9   :  { %v1186_v25 = vadd.f32 1.0, %v2056_v23 }
0x11fb   :  { %2059 = vrcp.f32 %v1186_v25 }
0x11fd   :  { %v2058_v26 = vpop.eup %2057 }
0x11fe   :  { %v1254_v28 = vadd.f32 1.0, %v2058_v26 }
0x1200   :  { %2061 = vrcp.f32 %v1254_v28 }
0x1205   :  { %v2060_v24 = vpop.eup %2059 }
0x1206   :  { %v1189_v29 = vmul.f32 2.0, %v2060_v24  ;;  %v1191_v41 = vmul.f32 %v2060_v24, %v2432_v54 }
0x1208   :  { %v1691_v30 = vadd.f32 -1.0, %v1189_v29 }
0x120a   :  { %v2062_v32 = vpop.eup %2061  ;;  %1193 = vrot.lane.b32.xlu0 %v1691_v30, %s2088_s20 }
0x120b   :  { %v1257_v27 = vmul.f32 2.0, %v2062_v32  ;;  %v1259_v44 = vmul.f32 %v2062_v32, %v2434_v55 }
0x120d   :  { %v1695_v33 = vadd.f32 -1.0, %v1257_v27 }
0x120f   :  { %1261 = vrot.lane.b32.xlu1 %v1695_v33, %s2088_s20 }
0x127c   :  { %v1194_v34 = vpop.permute.xlu0 %1193 }
0x127d   :  { %v1196_v36 = vmul.f32 %v2060_v24, %v1194_v34 }
0x127f   :  { %1198 = vrot.lane.b32.xlu0 %v1196_v36, %s2089_s23 }
0x1281   :  { %v1262_v37 = vpop.permute.xlu1 %1261 }
0x1282   :  { %v1264_v39 = vmul.f32 %v2062_v32, %v1262_v37 }
0x1284   :  { %1266 = vrot.lane.b32.xlu1 %v1264_v39, %s2089_s23 }
0x12f1   :  { %v1199_v42 = vpop.permute.xlu0 %1198 }
0x12f2   :  { %v2472_v43 = vadd.f32 %v1199_v42, %v1191_v41 }
0x12f4   :  { %2063 = vtanh.f32 %v2472_v43 }
0x12f6   :  { %v1267_v45 = vpop.permute.xlu1 %1266 }
0x12f7   :  { %v2476_v46 = vadd.f32 %v1267_v45, %v1259_v44 }
0x12f9   :  { %2065 = vtanh.f32 %v2476_v46 }
0x12fe   :  { %v2064_v47 = vpop.eup %2063 }
0x12ff   :  { %1204 = vrot.lane.b32.xlu0 %v2064_v47, %s2088_s20 }
0x1303   :  { %v2066_v48 = vpop.eup %2065 }
0x1304   :  { %1272 = vrot.lane.b32.xlu1 %v2066_v48, %s2088_s20 }
0x1371   :  { %v1205_v49 = vpop.permute.xlu0 %1204 }
0x1372   :  { %v1207_v50 = vmul.f32 %v2060_v24, %v1205_v49 }
0x1374   :  { %v1277_v51 = vpack.c.bf16 %v1207_v50, %v1207_v50  ;;  %v2085_v50 = vld [vmem:[%s2554_s6] ss:$0 sm:$0xff] }
0x1376   :  { %1279 = vrot.lane.b32.xlu0 %v1277_v51, %s2089_s23  ;;  %v1273_v53 = vpop.permute.xlu1 %1272 }
0x1377   :  { %v1275_v54 = vmul.f32 %v2062_v32, %v1273_v53 }
0x1379   :  { %v1276_v56 = vpack.c.bf16 %v1275_v54, %v1275_v54 }
0x137b   :  { %1325 = vrot.lane.b32.xlu1 %v1276_v56, %s2089_s23 }
0x13e8   :  { %v1280_v55 = vpop.permute.xlu0 %1279 }
0x13e9   :  { %1942 = vmatmul.mubr.msk.bf16.vlgmr.msra.gmra.mrb[36].mxu1 %vm67_vm1, %v1280_v55 }
0x13ea   :  { %1954 = vmatpush3.bf16.msra.mxu1 %v2152_v4  ;;  %1957 = vmatprep.mubr.msk.bf16.mxu1 %vm2087_vm0, %v2086_v0 }
0x13eb   :  { %1955 = vmatprep.subr.bf16.mxu1 %v2086_v0 }
0x13ed   :  { %v1326_v57 = vpop.permute.xlu1 %1325 }
0x13ee   :  { %1956 = vmatpush3.bf16.msra.mxu1 %v2161_v6  ;;  %1950 = vmatmul.mubr.msk.bf16.vlgmr.msra.gmra.mrb[40].mxu0 %vm67_vm1, %v1326_v57 }
0x13ef   :  { %1969 = vmatprep.subr.bf16.mxu1 %v2086_v0  ;;  %1962 = vmatpush3.bf16.msra.mxu0 %v2193_v31 }
0x13f0   :  { %1963 = vmatprep.subr.bf16.mxu0 %v2086_v0  ;;  %1965 = vmatprep.mubr.msk.bf16.mxu0 %vm2087_vm0, %v2086_v0 }
0x13f1   :  { %1958 = vmatmul.mubr.msk.bf16.vlgmr.msra.gmra.mrb[40].mxu1 %vm67_vm1, %v1326_v57 }
0x13f2   :  { %1970 = vmatpush3.bf16.msra.mxu1 %v2204_v35  ;;  %1973 = vmatprep.mubr.msk.bf16.mxu1 %vm2087_vm0, %v2086_v0  ;;  %v1700_v35 = vld [vmem:[%s2550_s0 + $0x38] sm:$0xff] }
0x13f3   :  { %1971 = vmatprep.subr.bf16.mxu1 %v2086_v0  ;;  %1964 = vmatpush3.bf16.msra.mxu0 %v2213_v38 }
0x13f4   :  { %1977 = vmatprep.subr.bf16.mxu0 %v2086_v0 }
0x13f6   :  { %1972 = vmatpush3.bf16.msra.mxu1 %v2221_v40 }
0x14bc   :  { %v1318_v4 = vpop.f32.mrb[36].mxu1 }
0x14bd   :  { %v1943_v6 = vpop.f32.mrb[37].mxu1 }
0x14be   :  { %v1321_v31 = vpop.f32.mrb[38].mxu1 }
0x14bf   :  { %v1944_v58 = vpop.f32.mrb[39].mxu1 }
0x14c1   :  { %v1364_v59 = vpop.f32.mrb[40].mxu0 }
0x14c2   :  { %v1365_v60 = vadd.f32 %v1364_v59, %v1318_v4  ;;  %v1951_v61 = vpop.f32.mrb[41].mxu0 }
0x14c3   :  { %v1367_v62 = vpop.f32.mrb[42].mxu0 }
0x14c4   :  { %v1370_v63 = vadd.f32 %v2256_v52, %v1365_v60  ;;  %v1432_v1 = vpop.f32.mrb[40].mxu1  ;;  %v1952_v38 = vpop.f32.mrb[43].mxu0  ;;  %v53_v62 = vld [vmem:[%s2555_s7 + $0x8] sm:$0xff] }
0x14c5   :  { %v1438_v2 = vadd.f32 %v1700_v35, %v1432_v1  ;;  %v1959_v3 = vpop.f32.mrb[41].mxu1  ;;  %v52_v35 = vld [vmem:[%s2555_s7] sm:$0xff]  ;;  %v55_v38 = vld [vmem:[%s2555_s7 + $0x18] sm:$0xff] }
0x14c6   :  { %v1698_v5 = vmul.f32 -1.442695, %v1370_v63  ;;  %v1435_v40 = vpop.f32.mrb[42].mxu1  ;;  %v54_v63 = vld [vmem:[%s2555_s7 + $0x10] sm:$0xff]  ;;  %v56_v1 = vpack.c.bf16 %v53_v62, %v52_v35 }
0x14c7   :  { %v1702_v7 = vmul.f32 -1.442695, %v1438_v2  ;;  %v1960_v8 = vpop.f32.mrb[43].mxu1  ;;  %v57_v2 = vpack.c.bf16 %v55_v38, %v54_v63 }
0x14c8   :  { %2067 = vpow2.f32 %v1698_v5 }
0x14c9   :  { %2069 = vpow2.f32 %v1702_v7 }
0x14d2   :  { %v2068_v9 = vpop.eup %2067 }
0x14d3   :  { %v2070_v11 = vpop.eup %2069  ;;  %v1374_v10 = vadd.f32 1.0, %v2068_v9  ;;  %v1708_v9 = vld [vmem:[%s2556_s8] ss:$0 sm:$0xff] }
0x14d4   :  { %v1442_v12 = vadd.f32 1.0, %v2070_v11 }
0x14d5   :  { %2071 = vrcp.f32 %v1374_v10 }
0x14d6   :  { %2073 = vrcp.f32 %v1442_v12 }
0x14df   :  { %v2072_v13 = vpop.eup %2071 }
0x14e0   :  { %v2074_v14 = vpop.eup %2073  ;;  %v1377_v15 = vmul.f32 2.0, %v2072_v13  ;;  %v1379_v22 = vmul.f32 %v2072_v13, %v2472_v43 }
0x14e1   :  { %v1445_v52 = vmul.f32 2.0, %v2074_v14  ;;  %v1447_v23 = vmul.f32 %v2074_v14, %v2476_v46 }
0x14e2   :  { %v1699_v16 = vadd.f32 -1.0, %v1377_v15 }
0x14e3   :  { %v1703_v17 = vadd.f32 -1.0, %v1445_v52 }
0x14e4   :  { %1381 = vrot.lane.b32.xlu0 %v1699_v16, %s2088_s20 }
0x14e5   :  { %1449 = vrot.lane.b32.xlu1 %v1703_v17, %s2088_s20 }
0x1556   :  { %v1382_v18 = vpop.permute.xlu0 %1381 }
0x1557   :  { %v1450_v19 = vpop.permute.xlu1 %1449  ;;  %v1384_v20 = vmul.f32 %v2072_v13, %v1382_v18 }
0x1558   :  { %v1452_v21 = vmul.f32 %v2074_v14, %v1450_v19 }
0x1559   :  { %1386 = vrot.lane.b32.xlu0 %v1384_v20, %s2089_s23 }
0x155a   :  { %1454 = vrot.lane.b32.xlu1 %v1452_v21, %s2089_s23 }
0x15cb   :  { %v1387_v25 = vpop.permute.xlu0 %1386 }
0x15cc   :  { %v1455_v26 = vpop.permute.xlu1 %1454  ;;  %v1389_v28 = vadd.f32 %v1387_v25, %v1379_v22 }
0x15cd   :  { %v1457_v24 = vadd.f32 %v1455_v26, %v1447_v23 }
0x15ce   :  { %2075 = vtanh.f32 %v1389_v28 }
0x15cf   :  { %2077 = vtanh.f32 %v1457_v24 }
0x15d8   :  { %v2076_v29 = vpop.eup %2075 }
0x15d9   :  { %v2078_v30 = vpop.eup %2077  ;;  %1392 = vrot.lane.b32.xlu0 %v2076_v29, %s2088_s20 }
0x15da   :  { %1460 = vrot.lane.b32.xlu1 %v2078_v30, %s2088_s20 }
0x164b   :  { %v1393_v32 = vpop.permute.xlu0 %1392 }
0x164c   :  { %v1461_v27 = vpop.permute.xlu1 %1460  ;;  %v1395_v33 = vmul.f32 %v2072_v13, %v1393_v32 }
0x164d   :  { %v1463_v34 = vmul.f32 %v2074_v14, %v1461_v27 }
0x164e   :  { %v1465_v36 = vpack.c.bf16 %v1395_v33, %v1395_v33 }
0x164f   :  { %v1464_v37 = vpack.c.bf16 %v1463_v34, %v1463_v34 }
0x1650   :  { %1467 = vrot.lane.b32.xlu0 %v1465_v36, %s2089_s23 }
0x1651   :  { %1513 = vrot.lane.b32.xlu1 %v1464_v37, %s2089_s23 }
0x16c2   :  { %v1468_v39 = vpop.permute.xlu0 %1467 }
0x16c3   :  { %v1514_v41 = vpop.permute.xlu1 %1513  ;;  %1966 = vmatmul.mubr.msk.bf16.vlgmr.msra.gmra.mrb[44].mxu0 %vm67_vm1, %v1468_v39 }
0x16c4   :  { %1974 = vmatmul.mubr.msk.bf16.vlgmr.msra.gmra.mrb[44].mxu1 %vm67_vm1, %v1514_v41  ;;  %1981 = vmatprep.mubr.msk.bf16.mxu0 %vm2087_vm0, %v2086_v0 }
0x16c5   :  { %1978 = vmatpush3.bf16.msra.mxu0 %v56_v1 }
0x16c6   :  { %1979 = vmatprep.subr.bf16.mxu0 %v2086_v0 }
0x16c9   :  { %1980 = vmatpush3.bf16.msra.mxu0 %v57_v2 }
0x1796   :  { %v1506_v42 = vpop.f32.mrb[44].mxu0 }
0x1797   :  { %v1552_v43 = vpop.f32.mrb[44].mxu1  ;;  %v1967_v44 = vpop.f32.mrb[45].mxu0 }
0x1798   :  { %v1553_v45 = vadd.f32 %v1552_v43, %v1506_v42  ;;  %v1975_v46 = vpop.f32.mrb[45].mxu1  ;;  %v1509_v47 = vpop.f32.mrb[46].mxu0 }
0x1799   :  { %v1555_v48 = vpop.f32.mrb[46].mxu1  ;;  %v1968_v49 = vpop.f32.mrb[47].mxu0 }
0x179a   :  { %v1558_v51 = vadd.f32 %v2085_v50, %v1553_v45  ;;  %v1976_v53 = vpop.f32.mrb[47].mxu1 }
0x179c   :  { %v1706_v54 = vmul.f32 -1.442695, %v1558_v51 }
0x179e   :  { %2079 = vpow2.f32 %v1706_v54 }
0x17a8   :  { %v2080_v56 = vpop.eup %2079 }
0x17a9   :  { %v1562_v55 = vadd.f32 1.0, %v2080_v56 }
0x17ab   :  { %2081 = vrcp.f32 %v1562_v55 }
0x17b5   :  { %v2082_v57 = vpop.eup %2081 }
0x17b6   :  { %v1565_v4 = vmul.f32 2.0, %v2082_v57  ;;  %v1567_v59 = vmul.f32 %v2082_v57, %v1389_v28 }
0x17b8   :  { %v1707_v6 = vadd.f32 -1.0, %v1565_v4 }
0x17ba   :  { %1569 = vrot.lane.b32.xlu0 %v1707_v6, %s2088_s20 }
0x182c   :  { %v1570_v31 = vpop.permute.xlu0 %1569 }
0x182d   :  { %v1572_v58 = vmul.f32 %v2082_v57, %v1570_v31 }
0x182f   :  { %1574 = vrot.lane.b32.xlu1 %v1572_v58, %s2089_s23 }
0x18a1   :  { %v1575_v60 = vpop.permute.xlu1 %1574 }
0x18a2   :  { %v1577_v61 = vadd.f32 %v1575_v60, %v1567_v59 }
0x18a4   :  { %2083 = vtanh.f32 %v1577_v61 }
0x18ae   :  { %v2084_v3 = vpop.eup %2083 }
0x18af   :  { %1580 = vrot.lane.b32.xlu0 %v2084_v3, %s2088_s20 }
0x1921   :  { %v1581_v5 = vpop.permute.xlu0 %1580 }
0x1922   :  { %v1583_v40 = vmul.f32 %v2082_v57, %v1581_v5 }
0x1924   :  { %v1584_v7 = vpack.c.bf16 %v1583_v40, %v1583_v40 }
0x1926   :  { %1592 = vrot.lane.b32.xlu1 %v1584_v7, %s2089_s23 }
0x1998   :  { %v1593_v8 = vpop.permute.xlu1 %1592 }
0x1999   :  { %1982 = vmatmul.mubr.msk.bf16.vlgmr.msra.gmra.mrb[48].mxu0 %vm67_vm1, %v1593_v8 }
0x1a6c   :  { %v1631_v11 = vpop.f32.mrb[48].mxu0 }
0x1a6d   :  { %v1632_v10 = vadd.f32 %v1708_v9, %v1631_v11  ;;  %v1983_v12 = vpop.f32.mrb[49].mxu0 }
0x1a6e   :  { %v1634_v0 = vpop.f32.mrb[50].mxu0 }
0x1a6f   :  { %1637 = vst [vmem:[%s2557_s9] sm:$0xff] %v1632_v10  ;;  %v1984_v13 = vpop.f32.mrb[51].mxu0 }

</bundles_post_ra>
